<compile_context>
chip_gen: v5e
topology: v5e:2x2
jax: 0.10.0
libtpu: 0.0.40
codegen_flags: <defaults>
</compile_context>

<pallas_src>
import functools
import math

import jax
import jax.numpy as jnp
from jax import lax
from jax.experimental import pallas as pl
from jax.experimental.pallas import tpu as pltpu

_NUM_SCALAR_PREFETCH = 1  # just the cursor


def _dilated_lstm_chunk_kernel(cursor_ref,            # SMEM scalar prefetch: (1,) int32
                               x_ref,                  # (Tc, B, I)  raw inputs (chunk)
                               hx0_ref, cx0_ref,       # (D, B, H)   initial state (f32)
                               w_ih_ref,               # (I, 4H)     input weights (resident)
                               w_hh_ref,               # (H, 4H)     recurrent weights (resident)
                               b_ref,                  # (1, 4H)     fused bias (f32, resident)
                               x_out_ref,              # (Tc, B, H)  per-step outputs (f32)
                               hx_ref, cx_ref,         # (D, B, H)   VMEM-resident state (aliased)
                               gx_ref,                 # (Tc, B, 4H) scratch: projected gates (f32)
                               *, dilation, hidden, tc, t_total):
    chunk = pl.program_id(0)

    # First chunk: pull the initial state into the resident (aliased) output buffers.
    @pl.when(chunk == 0)
    def _init():
        hx_ref[...] = hx0_ref[...]
        cx_ref[...] = cx0_ref[...]

    # Per-chunk input projection: one (Tc*B, I) x (I, 4H) MXU matmul, f32 accumulate.
    tc_, b_, i_ = x_ref.shape
    x_flat = x_ref[...].reshape(tc_ * b_, i_).astype(w_ih_ref.dtype)
    gx = jnp.dot(x_flat, w_ih_ref[...], preferred_element_type=jnp.float32)
    gx_ref[...] = gx.reshape(tc_, b_, 4 * hidden) + b_ref[...]

    cur0 = cursor_ref[0] + chunk * tc
    inv_d = 1.0 / dilation

    def step(t, carry):
        cur = (cur0 + t) % dilation
        h_prev = hx_ref[cur]                       # (B, H) dynamic slot select
        c_prev = cx_ref[cur]

        # Recurrent matmul only; the input projection was done once per chunk above.
        gates = gx_ref[t] + jnp.dot(h_prev.astype(w_hh_ref.dtype), w_hh_ref[...],
                                    preferred_element_type=jnp.float32)   # (B, 4H) f32

        # PyTorch LSTMCell gate order: i, f, g, o.  H % 128 == 0 => lane-aligned slices.
        i_g = jax.nn.sigmoid(gates[:, 0 * hidden:1 * hidden])
        f_g = jax.nn.sigmoid(gates[:, 1 * hidden:2 * hidden])
        g_g = jnp.tanh(gates[:, 2 * hidden:3 * hidden])
        o_g = jax.nn.sigmoid(gates[:, 3 * hidden:4 * hidden])

        c_new = f_g * c_prev + i_g * g_g
        h_new = o_g * jnp.tanh(c_new)

        # Skip state writes for zero-padded tail steps (T % Tc != 0).
        @pl.when(chunk * tc + t < t_total)
        def _():
            hx_ref[cur] = h_new
            cx_ref[cur] = c_new

        # x_t = mean over the updated dilation slots, recomputed exactly each step
        # (D-1 VALU adds of a (B, H) tile -> no long-horizon rounding drift).
        x_out_ref[t] = jnp.sum(hx_ref[...], axis=0) * inv_d
        return carry

    lax.fori_loop(0, tc, step, 0, unroll=True)


def dilated_lstm_sequence(inputs_seq, state, params, *, time_chunk=8,
                          matmul_dtype=jnp.bfloat16):
    """Run T DilatedLSTM steps in a single Pallas kernel.

    inputs_seq: (T, B, I) float32
    state:      (cursor, hx, cx) with hx, cx in kernel layout (dilation, B, H), float32
    params:     (w_ih, w_hh, b) = (I, 4H), (H, 4H), (1, 4H)
                (transposed PyTorch LSTMCell weights, b = b_ih + b_hh)
    Returns (x_seq: (T, B, H) float32, new_state).
    """
    cursor, hx, cx = state
    w_ih, w_hh, b = params
    T, B, I = inputs_seq.shape
    D, _, H = hx.shape

    tc = max(1, min(int(time_chunk), T))
    n_chunks = -(-T // tc)
    t_pad = n_chunks * tc
    if t_pad != T:
        x_in = jnp.concatenate(
            [inputs_seq, jnp.zeros((t_pad - T, B, I), inputs_seq.dtype)], axis=0)
    else:
        x_in = inputs_seq

    cursor_arr = jnp.reshape(jnp.asarray(cursor, dtype=jnp.int32), (1,))
    kernel = functools.partial(_dilated_lstm_chunk_kernel,
                               dilation=D, hidden=H, tc=tc, t_total=T)

    mm_bytes = jnp.dtype(matmul_dtype).itemsize
    f32b = 4
    # Advisory cost hint for XLA's scheduler around the serial kernel.
    cost = pl.CostEstimate(
        flops=2 * T * B * 4 * H * (I + H),
        transcendentals=5 * T * B * H,
        bytes_accessed=(t_pad * B * I * f32b           # raw inputs streamed in
                        + t_pad * B * H * f32b          # x outputs streamed out
                        + 4 * D * B * H * f32b          # state in + out
                        + (I + H) * 4 * H * mm_bytes    # weights
                        + 4 * H * f32b))                # bias

    # Explicit VMEM budget (double-buffered streams + resident state/weights + scratch).
    vmem_budget = (
        2 * 2 * (D * B * H * f32b) * 2                      # hx0/cx0 in + hx/cx out, 2-deep
        + 2 * ((I + H) * 4 * H * mm_bytes + 4 * H * f32b)   # W_ih, W_hh, bias, 2-deep
        + 2 * (tc * B * I * f32b + tc * B * H * f32b)       # input/output chunks, 2-deep
        + tc * B * 4 * H * f32b)                            # gx scratch
    vmem_limit = int(min(64 * 2 ** 20, max(32 * 2 ** 20, 2 * vmem_budget)))

    # hx/cx outputs share their inputs' HBM buffers (in-place slot update). Alias
    # indices count the scalar-prefetch operand first, hence the offset.
    io_aliases = {_NUM_SCALAR_PREFETCH + 1: 1,   # hx  -> hx_out
                  _NUM_SCALAR_PREFETCH + 2: 2}   # cx  -> cx_out

    x_pad, hx_new, cx_new = pl.pallas_call(
        kernel,
        out_shape=(jax.ShapeDtypeStruct((t_pad, B, H), jnp.float32),
                   jax.ShapeDtypeStruct((D, B, H), jnp.float32),
                   jax.ShapeDtypeStruct((D, B, H), jnp.float32)),
        grid_spec=pltpu.PrefetchScalarGridSpec(
            num_scalar_prefetch=_NUM_SCALAR_PREFETCH,
            grid=(n_chunks,),
            in_specs=[
                pl.BlockSpec((tc, B, I), lambda c, cur: (c, 0, 0)),   # raw inputs, streamed
                pl.BlockSpec((D, B, H), lambda c, cur: (0, 0, 0)),    # hx0, loaded once
                pl.BlockSpec((D, B, H), lambda c, cur: (0, 0, 0)),    # cx0, loaded once
                pl.BlockSpec((I, 4 * H), lambda c, cur: (0, 0)),      # W_ih, resident
                pl.BlockSpec((H, 4 * H), lambda c, cur: (0, 0)),      # W_hh, resident
                pl.BlockSpec((1, 4 * H), lambda c, cur: (0, 0)),      # bias, resident
            ],
            out_specs=(
                pl.BlockSpec((tc, B, H), lambda c, cur: (c, 0, 0)),   # x chunk, streamed
                pl.BlockSpec((D, B, H), lambda c, cur: (0, 0, 0)),    # hx, VMEM-resident
                pl.BlockSpec((D, B, H), lambda c, cur: (0, 0, 0)),    # cx, VMEM-resident
            ),
            scratch_shapes=[pltpu.VMEM((tc, B, 4 * H), jnp.float32)],
        ),
        input_output_aliases=io_aliases,
        compiler_params=pltpu.CompilerParams(
            dimension_semantics=("arbitrary",),     # time axis is a true recurrence
            vmem_limit_bytes=vmem_limit),
        cost_estimate=cost,
    )(cursor_arr, x_in, hx, cx,
      w_ih.astype(matmul_dtype), w_hh.astype(matmul_dtype), b.astype(jnp.float32))

    x_seq = x_pad if t_pad == T else x_pad[:T]
    new_cursor = (cursor + T) % D
    return x_seq, (new_cursor, hx_new, cx_new)


def dilated_lstm_step(inputs, state, params, *, matmul_dtype=jnp.bfloat16):
    """Single module-equivalent step: inputs (B, I) -> (x: (B, H), new_state)."""
    x_seq, new_state = dilated_lstm_sequence(inputs[None], state, params,
                                             time_chunk=1, matmul_dtype=matmul_dtype)
    return x_seq[0], new_state


def _reference_step(inputs, state, pt_params):
    """Pure-JAX mirror of the PyTorch module (state in (B, D, H) layout)."""
    cursor, hx, cx = state
    w_ih_pt, w_hh_pt, b_ih, b_hh = pt_params          # (4H,I), (4H,H), (4H,), (4H,)
    _, D, H = hx.shape
    h_prev, c_prev = hx[:, cursor], cx[:, cursor]
    gates = inputs @ w_ih_pt.T + b_ih + h_prev @ w_hh_pt.T + b_hh
    i = jax.nn.sigmoid(gates[:, 0 * H:1 * H])
    f = jax.nn.sigmoid(gates[:, 1 * H:2 * H])
    g = jnp.tanh(gates[:, 2 * H:3 * H])
    o = jax.nn.sigmoid(gates[:, 3 * H:4 * H])
    c_new = f * c_prev + i * g
    h_new = o * jnp.tanh(c_new)
    hx_new = hx.at[:, cursor].set(h_new)
    cx_new = cx.at[:, cursor].set(c_new)
    x = jnp.sum(hx_new, axis=1) / D
    return x, ((cursor + 1) % D, hx_new, cx_new)


if __name__ == "__main__":
    # H multiple of 128 (lane-dense gates/stores), B >= 8 (full f32 sublanes).
    # T=10 with time_chunk=4 exercises the padded-tail masking path.
    T, B, I, H, D = 10, 8, 64, 128, 4
    key = jax.random.PRNGKey(0)
    k1, k2, k3, k4, k5, k6, k7 = jax.random.split(key, 7)

    # PyTorch-style LSTMCell init: uniform(-1/sqrt(H), 1/sqrt(H)).
    bound = 1.0 / math.sqrt(H)
    w_ih_pt = jax.random.uniform(k1, (4 * H, I), jnp.float32, -bound, bound)
    w_hh_pt = jax.random.uniform(k2, (4 * H, H), jnp.float32, -bound, bound)
    b_ih = jax.random.uniform(k3, (4 * H,), jnp.float32, -bound, bound)
    b_hh = jax.random.uniform(k4, (4 * H,), jnp.float32, -bound, bound)

    # Kernel-friendly params: transposed weights, fused bias (1, 4H).
    params = (w_ih_pt.T, w_hh_pt.T, (b_ih + b_hh)[None, :])

    inputs_seq = jax.random.normal(k5, (T, B, I), jnp.float32)
    hx0 = jax.random.normal(k6, (B, D, H), jnp.float32)   # module layout (B, D, H)
    cx0 = jax.random.normal(k7, (B, D, H), jnp.float32)
    cursor0 = 1

    # One-time conversion to the persistent kernel layout (D, B, H); callers keep
    # state in this layout between calls (no per-step transposes).
    hx_dbh = jnp.transpose(hx0, (1, 0, 2))
    cx_dbh = jnp.transpose(cx0, (1, 0, 2))

    run_seq = jax.jit(dilated_lstm_sequence,
                      static_argnames=("time_chunk", "matmul_dtype"))

    # Pure-JAX reference: T applications of the module forward.
    state = (cursor0, hx0, cx0)
    x_refs = []
    for t in range(T):
        x_t, state = _reference_step(inputs_seq[t], state,
                                     (w_ih_pt, w_hh_pt, b_ih, b_hh))
        x_refs.append(x_t)
    x_ref = jnp.stack(x_refs)
    cur_ref, hx_ref_bdh, cx_ref_bdh = state

    # --- default path: bf16 MXU operands, chunked time axis with padded tail ---
    x_bf, (cur_bf, hx_bf, cx_bf) = run_seq(
        inputs_seq, (cursor0, hx_dbh, cx_dbh), params, time_chunk=4)
    jax.block_until_ready((x_bf, hx_bf, cx_bf))
    tol_bf = dict(rtol=5e-2, atol=5e-2)
    assert int(cur_bf) == int(cur_ref)
    assert jnp.allclose(x_bf, x_ref, **tol_bf)
    assert jnp.allclose(jnp.transpose(hx_bf, (1, 0, 2)), hx_ref_bdh, **tol_bf)
    assert jnp.allclose(jnp.transpose(cx_bf, (1, 0, 2)), cx_ref_bdh, **tol_bf)

    # --- f32 MXU path, different chunk size (T % Tc != 0 again) ---
    x_f32, (cur_f32, hx_f32, cx_f32) = run_seq(
        inputs_seq, (cursor0, hx_dbh, cx_dbh), params,
        time_chunk=8, matmul_dtype=jnp.float32)
    jax.block_until_ready((x_f32, hx_f32, cx_f32))
    tol = dict(rtol=1e-2, atol=1e-2)
    assert int(cur_f32) == int(cur_ref)
    assert jnp.allclose(x_f32, x_ref, **tol)
    assert jnp.allclose(jnp.transpose(hx_f32, (1, 0, 2)), hx_ref_bdh, **tol)
    assert jnp.allclose(jnp.transpose(cx_f32, (1, 0, 2)), cx_ref_bdh, **tol)

    # --- single-step wrapper (T=1) matches one module forward call ---
    x_1, (cur_1, hx_1, cx_1) = dilated_lstm_step(
        inputs_seq[0], (cursor0, hx_dbh, cx_dbh), params,
        matmul_dtype=jnp.float32)
    jax.block_until_ready((x_1, hx_1, cx_1))
    x_ref1, (cur_ref1, hx_ref1, _) = _reference_step(
        inputs_seq[0], (cursor0, hx0, cx0), (w_ih_pt, w_hh_pt, b_ih, b_hh))
    assert int(cur_1) == int(cur_ref1)
    assert jnp.allclose(x_1, x_ref1, **tol)
    assert jnp.allclose(jnp.transpose(hx_1, (1, 0, 2)), hx_ref1, **tol)

    print("KERNEL_OK")
</pallas_src>

<mosaic_0001>
module attributes {stable_mosaic.version = 11 : i64} {
  func.func @_dilated_lstm_chunk_kernel(%arg0: i32, %arg1: memref<1xi32, #tpu.memory_space<smem>>, %arg2: memref<4x8x64xf32, #tpu.memory_space<vmem>>, %arg3: memref<4x8x128xf32, #tpu.memory_space<vmem>>, %arg4: memref<4x8x128xf32, #tpu.memory_space<vmem>>, %arg5: memref<64x512xbf16, #tpu.memory_space<vmem>>, %arg6: memref<128x512xbf16, #tpu.memory_space<vmem>>, %arg7: memref<1x512xf32, #tpu.memory_space<vmem>>, %arg8: memref<4x8x128xf32, #tpu.memory_space<vmem>>, %arg9: memref<4x8x128xf32, #tpu.memory_space<vmem>>, %arg10: memref<4x8x128xf32, #tpu.memory_space<vmem>>, %arg11: memref<4x8x512xf32, #tpu.memory_space<vmem>>) attributes {dimension_semantics = [#tpu.dimension_semantics<arbitrary>], iteration_bounds = array<i64: 3>, scalar_prefetch = 1 : i64, scratch_operands = 1 : i64, tpu.core_type = #tpu.core_type<tc>, window_params = [{transform_indices = @transform_0, window_bounds = array<i64: 4, 8, 64>}, {pipeline_mode = #tpu.pipeline_mode<synchronous>, transform_indices = @transform_1, window_bounds = array<i64: 4, 8, 128>}, {pipeline_mode = #tpu.pipeline_mode<synchronous>, transform_indices = @transform_2, window_bounds = array<i64: 4, 8, 128>}, {pipeline_mode = #tpu.pipeline_mode<synchronous>, transform_indices = @transform_3, window_bounds = array<i64: 64, 512>}, {pipeline_mode = #tpu.pipeline_mode<synchronous>, transform_indices = @transform_4, window_bounds = array<i64: 128, 512>}, {pipeline_mode = #tpu.pipeline_mode<synchronous>, transform_indices = @transform_5, window_bounds = array<i64: 1, 512>}, {transform_indices = @transform_6, window_bounds = array<i64: 4, 8, 128>}, {pipeline_mode = #tpu.pipeline_mode<synchronous>, transform_indices = @transform_7, window_bounds = array<i64: 4, 8, 128>}, {pipeline_mode = #tpu.pipeline_mode<synchronous>, transform_indices = @transform_8, window_bounds = array<i64: 4, 8, 128>}]} {
    %c0_i32 = arith.constant 0 : i32
    %0 = arith.cmpi eq, %arg0, %c0_i32 : i32
    %1 = arith.extui %0 : i1 to i32
    %c0_i32_0 = arith.constant 0 : i32
    %2 = arith.cmpi ne, %1, %c0_i32_0 : i32
    scf.if %2 {
      %c0_124 = arith.constant 0 : index
      %c0_125 = arith.constant 0 : index
      %c0_126 = arith.constant 0 : index
      %265 = vector.load %arg3[%c0_124, %c0_125, %c0_126] : memref<4x8x128xf32, #tpu.memory_space<vmem>>, vector<4x8x128xf32>
      %c0_127 = arith.constant 0 : index
      %c0_128 = arith.constant 0 : index
      %c0_129 = arith.constant 0 : index
      %266 = vector.load %arg9[%c0_127, %c0_128, %c0_129] : memref<4x8x128xf32, #tpu.memory_space<vmem>>, vector<4x8x128xf32>
      tpu.vector_store %arg9[%c0_127, %c0_128, %c0_129], %265 {strides = array<i32>} : memref<4x8x128xf32, #tpu.memory_space<vmem>>, vector<4x8x128xf32>,
      %c0_130 = arith.constant 0 : index
      %c0_131 = arith.constant 0 : index
      %c0_132 = arith.constant 0 : index
      %267 = vector.load %arg4[%c0_130, %c0_131, %c0_132] : memref<4x8x128xf32, #tpu.memory_space<vmem>>, vector<4x8x128xf32>
      %c0_133 = arith.constant 0 : index
      %c0_134 = arith.constant 0 : index
      %c0_135 = arith.constant 0 : index
      %268 = vector.load %arg10[%c0_133, %c0_134, %c0_135] : memref<4x8x128xf32, #tpu.memory_space<vmem>>, vector<4x8x128xf32>
      tpu.vector_store %arg10[%c0_133, %c0_134, %c0_135], %267 {strides = array<i32>} : memref<4x8x128xf32, #tpu.memory_space<vmem>>, vector<4x8x128xf32>,
    } else {
    }
    %c0 = arith.constant 0 : index
    %c0_1 = arith.constant 0 : index
    %c0_2 = arith.constant 0 : index
    %3 = vector.load %arg2[%c0, %c0_1, %c0_2] : memref<4x8x64xf32, #tpu.memory_space<vmem>>, vector<4x8x64xf32>
    %4 = vector.shape_cast %3 : vector<4x8x64xf32> to vector<32x64xf32>
    %5 = arith.truncf %4 : vector<32x64xf32> to vector<32x64xbf16>
    %c0_3 = arith.constant 0 : index
    %c0_4 = arith.constant 0 : index
    %6 = vector.load %arg5[%c0_3, %c0_4] : memref<64x512xbf16, #tpu.memory_space<vmem>>, vector<64x512xbf16>
    %cst = arith.constant dense<0.000000e+00> : vector<32x512xf32>
    %7 = tpu.matmul %5, %6, %cst {dimension_numbers = #tpu.dot_dimension_numbers<[1], [0], [0], [1], [0, 0, 1, 1], [], []>} : vector<32x64xbf16>, vector<64x512xbf16>, vector<32x512xf32> -> vector<32x512xf32>
    %8 = vector.shape_cast %7 : vector<32x512xf32> to vector<4x8x512xf32>
    %c0_5 = arith.constant 0 : index
    %c0_6 = arith.constant 0 : index
    %9 = vector.load %arg7[%c0_5, %c0_6] : memref<1x512xf32, #tpu.memory_space<vmem>>, vector<1x512xf32>
    %10 = vector.shape_cast %9 : vector<1x512xf32> to vector<1x1x512xf32>
    %11 = vector.broadcast %10 : vector<1x1x512xf32> to vector<4x8x512xf32>
    %12 = arith.addf %8, %11 : vector<4x8x512xf32>
    %c0_7 = arith.constant 0 : index
    %c0_8 = arith.constant 0 : index
    %c0_9 = arith.constant 0 : index
    %13 = vector.load %arg11[%c0_7, %c0_8, %c0_9] : memref<4x8x512xf32, #tpu.memory_space<vmem>>, vector<4x8x512xf32>
    tpu.vector_store %arg11[%c0_7, %c0_8, %c0_9], %12 {strides = array<i32>} : memref<4x8x512xf32, #tpu.memory_space<vmem>>, vector<4x8x512xf32>,
    %c0_10 = arith.constant 0 : index
    %14 = memref.load %arg1[%c0_10] : memref<1xi32, #tpu.memory_space<smem>>
    %c4_i32 = arith.constant 4 : i32
    %15 = arith.muli %arg0, %c4_i32 : i32
    %16 = arith.addi %14, %15 : i32
    %c0_i32_11 = arith.constant 0 : i32
    %17 = arith.addi %16, %c0_i32_11 : i32
    %c4_i32_12 = arith.constant 4 : i32
    %c0_i32_13 = arith.constant 0 : i32
    %18 = arith.cmpi eq, %c4_i32_12, %c0_i32_13 : i32
    %c1_i32 = arith.constant 1 : i32
    %19 = arith.select %18, %c1_i32, %c4_i32_12 : i32
    %20 = arith.remsi %17, %19 : i32
    %c0_i32_14 = arith.constant 0 : i32
    %21 = arith.cmpi ne, %20, %c0_i32_14 : i32
    %c0_i32_15 = arith.constant 0 : i32
    %22 = arith.cmpi slt, %20, %c0_i32_15 : i32
    %c0_i32_16 = arith.constant 0 : i32
    %23 = arith.cmpi slt, %19, %c0_i32_16 : i32
    %24 = arith.xori %22, %23 : i1
    %25 = arith.andi %24, %21 : i1
    %26 = arith.addi %20, %19 : i32
    %27 = arith.select %25, %26, %20 : i32
    %28 = arith.index_cast %27 : i32 to index
    %c0_17 = arith.constant 0 : index
    %c0_18 = arith.constant 0 : index
    %29 = vector.load %arg9[%28, %c0_17, %c0_18] : memref<4x8x128xf32, #tpu.memory_space<vmem>>, vector<1x8x128xf32>
    %30 = vector.shape_cast %29 : vector<1x8x128xf32> to vector<8x128xf32>
    %31 = arith.index_cast %27 : i32 to index
    %c0_19 = arith.constant 0 : index
    %c0_20 = arith.constant 0 : index
    %32 = vector.load %arg10[%31, %c0_19, %c0_20] : memref<4x8x128xf32, #tpu.memory_space<vmem>>, vector<1x8x128xf32>
    %33 = vector.shape_cast %32 : vector<1x8x128xf32> to vector<8x128xf32>
    %34 = arith.index_cast %c0_i32_11 : i32 to index
    %c0_21 = arith.constant 0 : index
    %c0_22 = arith.constant 0 : index
    %35 = vector.load %arg11[%34, %c0_21, %c0_22] : memref<4x8x512xf32, #tpu.memory_space<vmem>>, vector<1x8x512xf32>
    %36 = vector.shape_cast %35 : vector<1x8x512xf32> to vector<8x512xf32>
    %37 = arith.truncf %30 : vector<8x128xf32> to vector<8x128xbf16>
    %c0_23 = arith.constant 0 : index
    %c0_24 = arith.constant 0 : index
    %38 = vector.load %arg6[%c0_23, %c0_24] : memref<128x512xbf16, #tpu.memory_space<vmem>>, vector<128x512xbf16>
    %cst_25 = arith.constant dense<0.000000e+00> : vector<8x512xf32>
    %39 = tpu.matmul %37, %38, %cst_25 {dimension_numbers = #tpu.dot_dimension_numbers<[1], [0], [0], [1], [0, 0, 1, 1], [], []>} : vector<8x128xbf16>, vector<128x512xbf16>, vector<8x512xf32> -> vector<8x512xf32>
    %40 = arith.addf %36, %39 : vector<8x512xf32>
    %41 = vector.extract_strided_slice %40 {offsets = [0, 0], sizes = [8, 128], strides = [1, 1]} : vector<8x512xf32> to vector<8x128xf32>
    %42 = arith.negf %41 : vector<8x128xf32>
    %43 = math.exp %42 : vector<8x128xf32>
    %cst_26 = arith.constant 1.000000e+00 : f32
    %44 = vector.broadcast %cst_26 : f32 to vector<8x128xf32>
    %45 = arith.addf %44, %43 : vector<8x128xf32>
    %46 = arith.divf %44, %45 : vector<8x128xf32>
    %47 = vector.extract_strided_slice %40 {offsets = [0, 128], sizes = [8, 128], strides = [1, 1]} : vector<8x512xf32> to vector<8x128xf32>
    %48 = arith.negf %47 : vector<8x128xf32>
    %49 = math.exp %48 : vector<8x128xf32>
    %cst_27 = arith.constant 1.000000e+00 : f32
    %50 = vector.broadcast %cst_27 : f32 to vector<8x128xf32>
    %51 = arith.addf %50, %49 : vector<8x128xf32>
    %52 = arith.divf %50, %51 : vector<8x128xf32>
    %53 = vector.extract_strided_slice %40 {offsets = [0, 256], sizes = [8, 128], strides = [1, 1]} : vector<8x512xf32> to vector<8x128xf32>
    %54 = math.tanh %53 : vector<8x128xf32>
    %55 = vector.extract_strided_slice %40 {offsets = [0, 384], sizes = [8, 128], strides = [1, 1]} : vector<8x512xf32> to vector<8x128xf32>
    %56 = arith.negf %55 : vector<8x128xf32>
    %57 = math.exp %56 : vector<8x128xf32>
    %cst_28 = arith.constant 1.000000e+00 : f32
    %58 = vector.broadcast %cst_28 : f32 to vector<8x128xf32>
    %59 = arith.addf %58, %57 : vector<8x128xf32>
    %60 = arith.divf %58, %59 : vector<8x128xf32>
    %61 = arith.mulf %52, %33 : vector<8x128xf32>
    %62 = arith.mulf %46, %54 : vector<8x128xf32>
    %63 = arith.addf %61, %62 : vector<8x128xf32>
    %64 = math.tanh %63 : vector<8x128xf32>
    %65 = arith.mulf %60, %64 : vector<8x128xf32>
    %c4_i32_29 = arith.constant 4 : i32
    %66 = arith.muli %arg0, %c4_i32_29 : i32
    %67 = arith.addi %66, %c0_i32_11 : i32
    %c10_i32 = arith.constant 10 : i32
    %68 = arith.cmpi slt, %67, %c10_i32 : i32
    %69 = arith.extui %68 : i1 to i32
    %c0_i32_30 = arith.constant 0 : i32
    %70 = arith.cmpi ne, %69, %c0_i32_30 : i32
    scf.if %70 {
      %265 = arith.index_cast %27 : i32 to index
      %c0_124 = arith.constant 0 : index
      %c0_125 = arith.constant 0 : index
      %266 = vector.load %arg9[%265, %c0_124, %c0_125] : memref<4x8x128xf32, #tpu.memory_space<vmem>>, vector<1x8x128xf32>
      %267 = vector.shape_cast %266 : vector<1x8x128xf32> to vector<8x128xf32>
      %268 = vector.shape_cast %65 : vector<8x128xf32> to vector<1x8x128xf32>
      tpu.vector_store %arg9[%265, %c0_124, %c0_125], %268 {strides = array<i32>} : memref<4x8x128xf32, #tpu.memory_space<vmem>>, vector<1x8x128xf32>,
      %269 = arith.index_cast %27 : i32 to index
      %c0_126 = arith.constant 0 : index
      %c0_127 = arith.constant 0 : index
      %270 = vector.load %arg10[%269, %c0_126, %c0_127] : memref<4x8x128xf32, #tpu.memory_space<vmem>>, vector<1x8x128xf32>
      %271 = vector.shape_cast %270 : vector<1x8x128xf32> to vector<8x128xf32>
      %272 = vector.shape_cast %63 : vector<8x128xf32> to vector<1x8x128xf32>
      tpu.vector_store %arg10[%269, %c0_126, %c0_127], %272 {strides = array<i32>} : memref<4x8x128xf32, #tpu.memory_space<vmem>>, vector<1x8x128xf32>,
    } else {
    }
    %c0_31 = arith.constant 0 : index
    %c0_32 = arith.constant 0 : index
    %c0_33 = arith.constant 0 : index
    %71 = vector.load %arg9[%c0_31, %c0_32, %c0_33] : memref<4x8x128xf32, #tpu.memory_space<vmem>>, vector<4x8x128xf32>
    %cst_34 = arith.constant dense<0.000000e+00> : vector<8x128xf32>
    %72 = vector.multi_reduction <add>, %71, %cst_34 [0] : vector<4x8x128xf32> to vector<8x128xf32>
    %cst_35 = arith.constant 2.500000e-01 : f32
    %73 = vector.broadcast %cst_35 : f32 to vector<8x128xf32>
    %74 = arith.mulf %72, %73 : vector<8x128xf32>
    %75 = arith.index_cast %c0_i32_11 : i32 to index
    %c0_36 = arith.constant 0 : index
    %c0_37 = arith.constant 0 : index
    %76 = vector.load %arg8[%75, %c0_36, %c0_37] : memref<4x8x128xf32, #tpu.memory_space<vmem>>, vector<1x8x128xf32>
    %77 = vector.shape_cast %76 : vector<1x8x128xf32> to vector<8x128xf32>
    %78 = vector.shape_cast %74 : vector<8x128xf32> to vector<1x8x128xf32>
    tpu.vector_store %arg8[%75, %c0_36, %c0_37], %78 {strides = array<i32>} : memref<4x8x128xf32, #tpu.memory_space<vmem>>, vector<1x8x128xf32>,
    %c1_i32_38 = arith.constant 1 : i32
    %79 = arith.addi %16, %c1_i32_38 : i32
    %c4_i32_39 = arith.constant 4 : i32
    %c0_i32_40 = arith.constant 0 : i32
    %80 = arith.cmpi eq, %c4_i32_39, %c0_i32_40 : i32
    %c1_i32_41 = arith.constant 1 : i32
    %81 = arith.select %80, %c1_i32_41, %c4_i32_39 : i32
    %82 = arith.remsi %79, %81 : i32
    %c0_i32_42 = arith.constant 0 : i32
    %83 = arith.cmpi ne, %82, %c0_i32_42 : i32
    %c0_i32_43 = arith.constant 0 : i32
    %84 = arith.cmpi slt, %82, %c0_i32_43 : i32
    %c0_i32_44 = arith.constant 0 : i32
    %85 = arith.cmpi slt, %81, %c0_i32_44 : i32
    %86 = arith.xori %84, %85 : i1
    %87 = arith.andi %86, %83 : i1
    %88 = arith.addi %82, %81 : i32
    %89 = arith.select %87, %88, %82 : i32
    %90 = arith.index_cast %89 : i32 to index
    %c0_45 = arith.constant 0 : index
    %c0_46 = arith.constant 0 : index
    %91 = vector.load %arg9[%90, %c0_45, %c0_46] : memref<4x8x128xf32, #tpu.memory_space<vmem>>, vector<1x8x128xf32>
    %92 = vector.shape_cast %91 : vector<1x8x128xf32> to vector<8x128xf32>
    %93 = arith.index_cast %89 : i32 to index
    %c0_47 = arith.constant 0 : index
    %c0_48 = arith.constant 0 : index
    %94 = vector.load %arg10[%93, %c0_47, %c0_48] : memref<4x8x128xf32, #tpu.memory_space<vmem>>, vector<1x8x128xf32>
    %95 = vector.shape_cast %94 : vector<1x8x128xf32> to vector<8x128xf32>
    %96 = arith.index_cast %c1_i32_38 : i32 to index
    %c0_49 = arith.constant 0 : index
    %c0_50 = arith.constant 0 : index
    %97 = vector.load %arg11[%96, %c0_49, %c0_50] : memref<4x8x512xf32, #tpu.memory_space<vmem>>, vector<1x8x512xf32>
    %98 = vector.shape_cast %97 : vector<1x8x512xf32> to vector<8x512xf32>
    %99 = arith.truncf %92 : vector<8x128xf32> to vector<8x128xbf16>
    %c0_51 = arith.constant 0 : index
    %c0_52 = arith.constant 0 : index
    %100 = vector.load %arg6[%c0_51, %c0_52] : memref<128x512xbf16, #tpu.memory_space<vmem>>, vector<128x512xbf16>
    %cst_53 = arith.constant dense<0.000000e+00> : vector<8x512xf32>
    %101 = tpu.matmul %99, %100, %cst_53 {dimension_numbers = #tpu.dot_dimension_numbers<[1], [0], [0], [1], [0, 0, 1, 1], [], []>} : vector<8x128xbf16>, vector<128x512xbf16>, vector<8x512xf32> -> vector<8x512xf32>
    %102 = arith.addf %98, %101 : vector<8x512xf32>
    %103 = vector.extract_strided_slice %102 {offsets = [0, 0], sizes = [8, 128], strides = [1, 1]} : vector<8x512xf32> to vector<8x128xf32>
    %104 = arith.negf %103 : vector<8x128xf32>
    %105 = math.exp %104 : vector<8x128xf32>
    %cst_54 = arith.constant 1.000000e+00 : f32
    %106 = vector.broadcast %cst_54 : f32 to vector<8x128xf32>
    %107 = arith.addf %106, %105 : vector<8x128xf32>
    %108 = arith.divf %106, %107 : vector<8x128xf32>
    %109 = vector.extract_strided_slice %102 {offsets = [0, 128], sizes = [8, 128], strides = [1, 1]} : vector<8x512xf32> to vector<8x128xf32>
    %110 = arith.negf %109 : vector<8x128xf32>
    %111 = math.exp %110 : vector<8x128xf32>
    %cst_55 = arith.constant 1.000000e+00 : f32
    %112 = vector.broadcast %cst_55 : f32 to vector<8x128xf32>
    %113 = arith.addf %112, %111 : vector<8x128xf32>
    %114 = arith.divf %112, %113 : vector<8x128xf32>
    %115 = vector.extract_strided_slice %102 {offsets = [0, 256], sizes = [8, 128], strides = [1, 1]} : vector<8x512xf32> to vector<8x128xf32>
    %116 = math.tanh %115 : vector<8x128xf32>
    %117 = vector.extract_strided_slice %102 {offsets = [0, 384], sizes = [8, 128], strides = [1, 1]} : vector<8x512xf32> to vector<8x128xf32>
    %118 = arith.negf %117 : vector<8x128xf32>
    %119 = math.exp %118 : vector<8x128xf32>
    %cst_56 = arith.constant 1.000000e+00 : f32
    %120 = vector.broadcast %cst_56 : f32 to vector<8x128xf32>
    %121 = arith.addf %120, %119 : vector<8x128xf32>
    %122 = arith.divf %120, %121 : vector<8x128xf32>
    %123 = arith.mulf %114, %95 : vector<8x128xf32>
    %124 = arith.mulf %108, %116 : vector<8x128xf32>
    %125 = arith.addf %123, %124 : vector<8x128xf32>
    %126 = math.tanh %125 : vector<8x128xf32>
    %127 = arith.mulf %122, %126 : vector<8x128xf32>
    %c4_i32_57 = arith.constant 4 : i32
    %128 = arith.muli %arg0, %c4_i32_57 : i32
    %129 = arith.addi %128, %c1_i32_38 : i32
    %c10_i32_58 = arith.constant 10 : i32
    %130 = arith.cmpi slt, %129, %c10_i32_58 : i32
    %131 = arith.extui %130 : i1 to i32
    %c0_i32_59 = arith.constant 0 : i32
    %132 = arith.cmpi ne, %131, %c0_i32_59 : i32
    scf.if %132 {
      %265 = arith.index_cast %89 : i32 to index
      %c0_124 = arith.constant 0 : index
      %c0_125 = arith.constant 0 : index
      %266 = vector.load %arg9[%265, %c0_124, %c0_125] : memref<4x8x128xf32, #tpu.memory_space<vmem>>, vector<1x8x128xf32>
      %267 = vector.shape_cast %266 : vector<1x8x128xf32> to vector<8x128xf32>
      %268 = vector.shape_cast %127 : vector<8x128xf32> to vector<1x8x128xf32>
      tpu.vector_store %arg9[%265, %c0_124, %c0_125], %268 {strides = array<i32>} : memref<4x8x128xf32, #tpu.memory_space<vmem>>, vector<1x8x128xf32>,
      %269 = arith.index_cast %89 : i32 to index
      %c0_126 = arith.constant 0 : index
      %c0_127 = arith.constant 0 : index
      %270 = vector.load %arg10[%269, %c0_126, %c0_127] : memref<4x8x128xf32, #tpu.memory_space<vmem>>, vector<1x8x128xf32>
      %271 = vector.shape_cast %270 : vector<1x8x128xf32> to vector<8x128xf32>
      %272 = vector.shape_cast %125 : vector<8x128xf32> to vector<1x8x128xf32>
      tpu.vector_store %arg10[%269, %c0_126, %c0_127], %272 {strides = array<i32>} : memref<4x8x128xf32, #tpu.memory_space<vmem>>, vector<1x8x128xf32>,
    } else {
    }
    %c0_60 = arith.constant 0 : index
    %c0_61 = arith.constant 0 : index
    %c0_62 = arith.constant 0 : index
    %133 = vector.load %arg9[%c0_60, %c0_61, %c0_62] : memref<4x8x128xf32, #tpu.memory_space<vmem>>, vector<4x8x128xf32>
    %cst_63 = arith.constant dense<0.000000e+00> : vector<8x128xf32>
    %134 = vector.multi_reduction <add>, %133, %cst_63 [0] : vector<4x8x128xf32> to vector<8x128xf32>
    %cst_64 = arith.constant 2.500000e-01 : f32
    %135 = vector.broadcast %cst_64 : f32 to vector<8x128xf32>
    %136 = arith.mulf %134, %135 : vector<8x128xf32>
    %137 = arith.index_cast %c1_i32_38 : i32 to index
    %c0_65 = arith.constant 0 : index
    %c0_66 = arith.constant 0 : index
    %138 = vector.load %arg8[%137, %c0_65, %c0_66] : memref<4x8x128xf32, #tpu.memory_space<vmem>>, vector<1x8x128xf32>
    %139 = vector.shape_cast %138 : vector<1x8x128xf32> to vector<8x128xf32>
    %140 = vector.shape_cast %136 : vector<8x128xf32> to vector<1x8x128xf32>
    tpu.vector_store %arg8[%137, %c0_65, %c0_66], %140 {strides = array<i32>} : memref<4x8x128xf32, #tpu.memory_space<vmem>>, vector<1x8x128xf32>,
    %c2_i32 = arith.constant 2 : i32
    %141 = arith.addi %16, %c2_i32 : i32
    %c4_i32_67 = arith.constant 4 : i32
    %c0_i32_68 = arith.constant 0 : i32
    %142 = arith.cmpi eq, %c4_i32_67, %c0_i32_68 : i32
    %c1_i32_69 = arith.constant 1 : i32
    %143 = arith.select %142, %c1_i32_69, %c4_i32_67 : i32
    %144 = arith.remsi %141, %143 : i32
    %c0_i32_70 = arith.constant 0 : i32
    %145 = arith.cmpi ne, %144, %c0_i32_70 : i32
    %c0_i32_71 = arith.constant 0 : i32
    %146 = arith.cmpi slt, %144, %c0_i32_71 : i32
    %c0_i32_72 = arith.constant 0 : i32
    %147 = arith.cmpi slt, %143, %c0_i32_72 : i32
    %148 = arith.xori %146, %147 : i1
    %149 = arith.andi %148, %145 : i1
    %150 = arith.addi %144, %143 : i32
    %151 = arith.select %149, %150, %144 : i32
    %152 = arith.index_cast %151 : i32 to index
    %c0_73 = arith.constant 0 : index
    %c0_74 = arith.constant 0 : index
    %153 = vector.load %arg9[%152, %c0_73, %c0_74] : memref<4x8x128xf32, #tpu.memory_space<vmem>>, vector<1x8x128xf32>
    %154 = vector.shape_cast %153 : vector<1x8x128xf32> to vector<8x128xf32>
    %155 = arith.index_cast %151 : i32 to index
    %c0_75 = arith.constant 0 : index
    %c0_76 = arith.constant 0 : index
    %156 = vector.load %arg10[%155, %c0_75, %c0_76] : memref<4x8x128xf32, #tpu.memory_space<vmem>>, vector<1x8x128xf32>
    %157 = vector.shape_cast %156 : vector<1x8x128xf32> to vector<8x128xf32>
    %158 = arith.index_cast %c2_i32 : i32 to index
    %c0_77 = arith.constant 0 : index
    %c0_78 = arith.constant 0 : index
    %159 = vector.load %arg11[%158, %c0_77, %c0_78] : memref<4x8x512xf32, #tpu.memory_space<vmem>>, vector<1x8x512xf32>
    %160 = vector.shape_cast %159 : vector<1x8x512xf32> to vector<8x512xf32>
    %161 = arith.truncf %154 : vector<8x128xf32> to vector<8x128xbf16>
    %c0_79 = arith.constant 0 : index
    %c0_80 = arith.constant 0 : index
    %162 = vector.load %arg6[%c0_79, %c0_80] : memref<128x512xbf16, #tpu.memory_space<vmem>>, vector<128x512xbf16>
    %cst_81 = arith.constant dense<0.000000e+00> : vector<8x512xf32>
    %163 = tpu.matmul %161, %162, %cst_81 {dimension_numbers = #tpu.dot_dimension_numbers<[1], [0], [0], [1], [0, 0, 1, 1], [], []>} : vector<8x128xbf16>, vector<128x512xbf16>, vector<8x512xf32> -> vector<8x512xf32>
    %164 = arith.addf %160, %163 : vector<8x512xf32>
    %165 = vector.extract_strided_slice %164 {offsets = [0, 0], sizes = [8, 128], strides = [1, 1]} : vector<8x512xf32> to vector<8x128xf32>
    %166 = arith.negf %165 : vector<8x128xf32>
    %167 = math.exp %166 : vector<8x128xf32>
    %cst_82 = arith.constant 1.000000e+00 : f32
    %168 = vector.broadcast %cst_82 : f32 to vector<8x128xf32>
    %169 = arith.addf %168, %167 : vector<8x128xf32>
    %170 = arith.divf %168, %169 : vector<8x128xf32>
    %171 = vector.extract_strided_slice %164 {offsets = [0, 128], sizes = [8, 128], strides = [1, 1]} : vector<8x512xf32> to vector<8x128xf32>
    %172 = arith.negf %171 : vector<8x128xf32>
    %173 = math.exp %172 : vector<8x128xf32>
    %cst_83 = arith.constant 1.000000e+00 : f32
    %174 = vector.broadcast %cst_83 : f32 to vector<8x128xf32>
    %175 = arith.addf %174, %173 : vector<8x128xf32>
    %176 = arith.divf %174, %175 : vector<8x128xf32>
    %177 = vector.extract_strided_slice %164 {offsets = [0, 256], sizes = [8, 128], strides = [1, 1]} : vector<8x512xf32> to vector<8x128xf32>
    %178 = math.tanh %177 : vector<8x128xf32>
    %179 = vector.extract_strided_slice %164 {offsets = [0, 384], sizes = [8, 128], strides = [1, 1]} : vector<8x512xf32> to vector<8x128xf32>
    %180 = arith.negf %179 : vector<8x128xf32>
    %181 = math.exp %180 : vector<8x128xf32>
    %cst_84 = arith.constant 1.000000e+00 : f32
    %182 = vector.broadcast %cst_84 : f32 to vector<8x128xf32>
    %183 = arith.addf %182, %181 : vector<8x128xf32>
    %184 = arith.divf %182, %183 : vector<8x128xf32>
    %185 = arith.mulf %176, %157 : vector<8x128xf32>
    %186 = arith.mulf %170, %178 : vector<8x128xf32>
    %187 = arith.addf %185, %186 : vector<8x128xf32>
    %188 = math.tanh %187 : vector<8x128xf32>
    %189 = arith.mulf %184, %188 : vector<8x128xf32>
    %c4_i32_85 = arith.constant 4 : i32
    %190 = arith.muli %arg0, %c4_i32_85 : i32
    %191 = arith.addi %190, %c2_i32 : i32
    %c10_i32_86 = arith.constant 10 : i32
    %192 = arith.cmpi slt, %191, %c10_i32_86 : i32
    %193 = arith.extui %192 : i1 to i32
    %c0_i32_87 = arith.constant 0 : i32
    %194 = arith.cmpi ne, %193, %c0_i32_87 : i32
    scf.if %194 {
      %265 = arith.index_cast %151 : i32 to index
      %c0_124 = arith.constant 0 : index
      %c0_125 = arith.constant 0 : index
      %266 = vector.load %arg9[%265, %c0_124, %c0_125] : memref<4x8x128xf32, #tpu.memory_space<vmem>>, vector<1x8x128xf32>
      %267 = vector.shape_cast %266 : vector<1x8x128xf32> to vector<8x128xf32>
      %268 = vector.shape_cast %189 : vector<8x128xf32> to vector<1x8x128xf32>
      tpu.vector_store %arg9[%265, %c0_124, %c0_125], %268 {strides = array<i32>} : memref<4x8x128xf32, #tpu.memory_space<vmem>>, vector<1x8x128xf32>,
      %269 = arith.index_cast %151 : i32 to index
      %c0_126 = arith.constant 0 : index
      %c0_127 = arith.constant 0 : index
      %270 = vector.load %arg10[%269, %c0_126, %c0_127] : memref<4x8x128xf32, #tpu.memory_space<vmem>>, vector<1x8x128xf32>
      %271 = vector.shape_cast %270 : vector<1x8x128xf32> to vector<8x128xf32>
      %272 = vector.shape_cast %187 : vector<8x128xf32> to vector<1x8x128xf32>
      tpu.vector_store %arg10[%269, %c0_126, %c0_127], %272 {strides = array<i32>} : memref<4x8x128xf32, #tpu.memory_space<vmem>>, vector<1x8x128xf32>,
    } else {
    }
    %c0_88 = arith.constant 0 : index
    %c0_89 = arith.constant 0 : index
    %c0_90 = arith.constant 0 : index
    %195 = vector.load %arg9[%c0_88, %c0_89, %c0_90] : memref<4x8x128xf32, #tpu.memory_space<vmem>>, vector<4x8x128xf32>
    %cst_91 = arith.constant dense<0.000000e+00> : vector<8x128xf32>
    %196 = vector.multi_reduction <add>, %195, %cst_91 [0] : vector<4x8x128xf32> to vector<8x128xf32>
    %cst_92 = arith.constant 2.500000e-01 : f32
    %197 = vector.broadcast %cst_92 : f32 to vector<8x128xf32>
    %198 = arith.mulf %196, %197 : vector<8x128xf32>
    %199 = arith.index_cast %c2_i32 : i32 to index
    %c0_93 = arith.constant 0 : index
    %c0_94 = arith.constant 0 : index
    %200 = vector.load %arg8[%199, %c0_93, %c0_94] : memref<4x8x128xf32, #tpu.memory_space<vmem>>, vector<1x8x128xf32>
    %201 = vector.shape_cast %200 : vector<1x8x128xf32> to vector<8x128xf32>
    %202 = vector.shape_cast %198 : vector<8x128xf32> to vector<1x8x128xf32>
    tpu.vector_store %arg8[%199, %c0_93, %c0_94], %202 {strides = array<i32>} : memref<4x8x128xf32, #tpu.memory_space<vmem>>, vector<1x8x128xf32>,
    %c3_i32 = arith.constant 3 : i32
    %203 = arith.addi %16, %c3_i32 : i32
    %c4_i32_95 = arith.constant 4 : i32
    %c0_i32_96 = arith.constant 0 : i32
    %204 = arith.cmpi eq, %c4_i32_95, %c0_i32_96 : i32
    %c1_i32_97 = arith.constant 1 : i32
    %205 = arith.select %204, %c1_i32_97, %c4_i32_95 : i32
    %206 = arith.remsi %203, %205 : i32
    %c0_i32_98 = arith.constant 0 : i32
    %207 = arith.cmpi ne, %206, %c0_i32_98 : i32
    %c0_i32_99 = arith.constant 0 : i32
    %208 = arith.cmpi slt, %206, %c0_i32_99 : i32
    %c0_i32_100 = arith.constant 0 : i32
    %209 = arith.cmpi slt, %205, %c0_i32_100 : i32
    %210 = arith.xori %208, %209 : i1
    %211 = arith.andi %210, %207 : i1
    %212 = arith.addi %206, %205 : i32
    %213 = arith.select %211, %212, %206 : i32
    %214 = arith.index_cast %213 : i32 to index
    %c0_101 = arith.constant 0 : index
    %c0_102 = arith.constant 0 : index
    %215 = vector.load %arg9[%214, %c0_101, %c0_102] : memref<4x8x128xf32, #tpu.memory_space<vmem>>, vector<1x8x128xf32>
    %216 = vector.shape_cast %215 : vector<1x8x128xf32> to vector<8x128xf32>
    %217 = arith.index_cast %213 : i32 to index
    %c0_103 = arith.constant 0 : index
    %c0_104 = arith.constant 0 : index
    %218 = vector.load %arg10[%217, %c0_103, %c0_104] : memref<4x8x128xf32, #tpu.memory_space<vmem>>, vector<1x8x128xf32>
    %219 = vector.shape_cast %218 : vector<1x8x128xf32> to vector<8x128xf32>
    %220 = arith.index_cast %c3_i32 : i32 to index
    %c0_105 = arith.constant 0 : index
    %c0_106 = arith.constant 0 : index
    %221 = vector.load %arg11[%220, %c0_105, %c0_106] : memref<4x8x512xf32, #tpu.memory_space<vmem>>, vector<1x8x512xf32>
    %222 = vector.shape_cast %221 : vector<1x8x512xf32> to vector<8x512xf32>
    %223 = arith.truncf %216 : vector<8x128xf32> to vector<8x128xbf16>
    %c0_107 = arith.constant 0 : index
    %c0_108 = arith.constant 0 : index
    %224 = vector.load %arg6[%c0_107, %c0_108] : memref<128x512xbf16, #tpu.memory_space<vmem>>, vector<128x512xbf16>
    %cst_109 = arith.constant dense<0.000000e+00> : vector<8x512xf32>
    %225 = tpu.matmul %223, %224, %cst_109 {dimension_numbers = #tpu.dot_dimension_numbers<[1], [0], [0], [1], [0, 0, 1, 1], [], []>} : vector<8x128xbf16>, vector<128x512xbf16>, vector<8x512xf32> -> vector<8x512xf32>
    %226 = arith.addf %222, %225 : vector<8x512xf32>
    %227 = vector.extract_strided_slice %226 {offsets = [0, 0], sizes = [8, 128], strides = [1, 1]} : vector<8x512xf32> to vector<8x128xf32>
    %228 = arith.negf %227 : vector<8x128xf32>
    %229 = math.exp %228 : vector<8x128xf32>
    %cst_110 = arith.constant 1.000000e+00 : f32
    %230 = vector.broadcast %cst_110 : f32 to vector<8x128xf32>
    %231 = arith.addf %230, %229 : vector<8x128xf32>
    %232 = arith.divf %230, %231 : vector<8x128xf32>
    %233 = vector.extract_strided_slice %226 {offsets = [0, 128], sizes = [8, 128], strides = [1, 1]} : vector<8x512xf32> to vector<8x128xf32>
    %234 = arith.negf %233 : vector<8x128xf32>
    %235 = math.exp %234 : vector<8x128xf32>
    %cst_111 = arith.constant 1.000000e+00 : f32
    %236 = vector.broadcast %cst_111 : f32 to vector<8x128xf32>
    %237 = arith.addf %236, %235 : vector<8x128xf32>
    %238 = arith.divf %236, %237 : vector<8x128xf32>
    %239 = vector.extract_strided_slice %226 {offsets = [0, 256], sizes = [8, 128], strides = [1, 1]} : vector<8x512xf32> to vector<8x128xf32>
    %240 = math.tanh %239 : vector<8x128xf32>
    %241 = vector.extract_strided_slice %226 {offsets = [0, 384], sizes = [8, 128], strides = [1, 1]} : vector<8x512xf32> to vector<8x128xf32>
    %242 = arith.negf %241 : vector<8x128xf32>
    %243 = math.exp %242 : vector<8x128xf32>
    %cst_112 = arith.constant 1.000000e+00 : f32
    %244 = vector.broadcast %cst_112 : f32 to vector<8x128xf32>
    %245 = arith.addf %244, %243 : vector<8x128xf32>
    %246 = arith.divf %244, %245 : vector<8x128xf32>
    %247 = arith.mulf %238, %219 : vector<8x128xf32>
    %248 = arith.mulf %232, %240 : vector<8x128xf32>
    %249 = arith.addf %247, %248 : vector<8x128xf32>
    %250 = math.tanh %249 : vector<8x128xf32>
    %251 = arith.mulf %246, %250 : vector<8x128xf32>
    %c4_i32_113 = arith.constant 4 : i32
    %252 = arith.muli %arg0, %c4_i32_113 : i32
    %253 = arith.addi %252, %c3_i32 : i32
    %c10_i32_114 = arith.constant 10 : i32
    %254 = arith.cmpi slt, %253, %c10_i32_114 : i32
    %255 = arith.extui %254 : i1 to i32
    %c0_i32_115 = arith.constant 0 : i32
    %256 = arith.cmpi ne, %255, %c0_i32_115 : i32
    scf.if %256 {
      %265 = arith.index_cast %213 : i32 to index
      %c0_124 = arith.constant 0 : index
      %c0_125 = arith.constant 0 : index
      %266 = vector.load %arg9[%265, %c0_124, %c0_125] : memref<4x8x128xf32, #tpu.memory_space<vmem>>, vector<1x8x128xf32>
      %267 = vector.shape_cast %266 : vector<1x8x128xf32> to vector<8x128xf32>
      %268 = vector.shape_cast %251 : vector<8x128xf32> to vector<1x8x128xf32>
      tpu.vector_store %arg9[%265, %c0_124, %c0_125], %268 {strides = array<i32>} : memref<4x8x128xf32, #tpu.memory_space<vmem>>, vector<1x8x128xf32>,
      %269 = arith.index_cast %213 : i32 to index
      %c0_126 = arith.constant 0 : index
      %c0_127 = arith.constant 0 : index
      %270 = vector.load %arg10[%269, %c0_126, %c0_127] : memref<4x8x128xf32, #tpu.memory_space<vmem>>, vector<1x8x128xf32>
      %271 = vector.shape_cast %270 : vector<1x8x128xf32> to vector<8x128xf32>
      %272 = vector.shape_cast %249 : vector<8x128xf32> to vector<1x8x128xf32>
      tpu.vector_store %arg10[%269, %c0_126, %c0_127], %272 {strides = array<i32>} : memref<4x8x128xf32, #tpu.memory_space<vmem>>, vector<1x8x128xf32>,
    } else {
    }
    %c0_116 = arith.constant 0 : index
    %c0_117 = arith.constant 0 : index
    %c0_118 = arith.constant 0 : index
    %257 = vector.load %arg9[%c0_116, %c0_117, %c0_118] : memref<4x8x128xf32, #tpu.memory_space<vmem>>, vector<4x8x128xf32>
    %cst_119 = arith.constant dense<0.000000e+00> : vector<8x128xf32>
    %258 = vector.multi_reduction <add>, %257, %cst_119 [0] : vector<4x8x128xf32> to vector<8x128xf32>
    %cst_120 = arith.constant 2.500000e-01 : f32
    %259 = vector.broadcast %cst_120 : f32 to vector<8x128xf32>
    %260 = arith.mulf %258, %259 : vector<8x128xf32>
    %261 = arith.index_cast %c3_i32 : i32 to index
    %c0_121 = arith.constant 0 : index
    %c0_122 = arith.constant 0 : index
    %262 = vector.load %arg8[%261, %c0_121, %c0_122] : memref<4x8x128xf32, #tpu.memory_space<vmem>>, vector<1x8x128xf32>
    %263 = vector.shape_cast %262 : vector<1x8x128xf32> to vector<8x128xf32>
    %264 = vector.shape_cast %260 : vector<8x128xf32> to vector<1x8x128xf32>
    tpu.vector_store %arg8[%261, %c0_121, %c0_122], %264 {strides = array<i32>} : memref<4x8x128xf32, #tpu.memory_space<vmem>>, vector<1x8x128xf32>,
    %c4_i32_123 = arith.constant 4 : i32
    return
  }
  func.func @transform_0(%arg0: i32, %arg1: memref<1xi32, #tpu.memory_space<smem>>) -> (i32, i32, i32) {
    %c0_i32 = arith.constant 0 : i32
    %c0_i32_0 = arith.constant 0 : i32
    %c0_i32_1 = arith.constant 0 : i32
    return %arg0, %c0_i32, %c0_i32_0 : i32, i32, i32
  }
  func.func @transform_1(%arg0: i32, %arg1: memref<1xi32, #tpu.memory_space<smem>>) -> (i32, i32, i32) {
    %c0_i32 = arith.constant 0 : i32
    %c0_i32_0 = arith.constant 0 : i32
    %c0_i32_1 = arith.constant 0 : i32
    %c0_i32_2 = arith.constant 0 : i32
    return %c0_i32, %c0_i32_0, %c0_i32_1 : i32, i32, i32
  }
  func.func @transform_2(%arg0: i32, %arg1: memref<1xi32, #tpu.memory_space<smem>>) -> (i32, i32, i32) {
    %c0_i32 = arith.constant 0 : i32
    %c0_i32_0 = arith.constant 0 : i32
    %c0_i32_1 = arith.constant 0 : i32
    %c0_i32_2 = arith.constant 0 : i32
    return %c0_i32, %c0_i32_0, %c0_i32_1 : i32, i32, i32
  }
  func.func @transform_3(%arg0: i32, %arg1: memref<1xi32, #tpu.memory_space<smem>>) -> (i32, i32) {
    %c0_i32 = arith.constant 0 : i32
    %c0_i32_0 = arith.constant 0 : i32
    %c0_i32_1 = arith.constant 0 : i32
    return %c0_i32, %c0_i32_0 : i32, i32
  }
  func.func @transform_4(%arg0: i32, %arg1: memref<1xi32, #tpu.memory_space<smem>>) -> (i32, i32) {
    %c0_i32 = arith.constant 0 : i32
    %c0_i32_0 = arith.constant 0 : i32
    %c0_i32_1 = arith.constant 0 : i32
    return %c0_i32, %c0_i32_0 : i32, i32
  }
  func.func @transform_5(%arg0: i32, %arg1: memref<1xi32, #tpu.memory_space<smem>>) -> (i32, i32) {
    %c0_i32 = arith.constant 0 : i32
    %c0_i32_0 = arith.constant 0 : i32
    %c0_i32_1 = arith.constant 0 : i32
    return %c0_i32, %c0_i32_0 : i32, i32
  }
  func.func @transform_6(%arg0: i32, %arg1: memref<1xi32, #tpu.memory_space<smem>>) -> (i32, i32, i32) {
    %c0_i32 = arith.constant 0 : i32
    %c0_i32_0 = arith.constant 0 : i32
    %c0_i32_1 = arith.constant 0 : i32
    return %arg0, %c0_i32, %c0_i32_0 : i32, i32, i32
  }
  func.func @transform_7(%arg0: i32, %arg1: memref<1xi32, #tpu.memory_space<smem>>) -> (i32, i32, i32) {
    %c0_i32 = arith.constant 0 : i32
    %c0_i32_0 = arith.constant 0 : i32
    %c0_i32_1 = arith.constant 0 : i32
    %c0_i32_2 = arith.constant 0 : i32
    return %c0_i32, %c0_i32_0, %c0_i32_1 : i32, i32, i32
  }
  func.func @transform_8(%arg0: i32, %arg1: memref<1xi32, #tpu.memory_space<smem>>) -> (i32, i32, i32) {
    %c0_i32 = arith.constant 0 : i32
    %c0_i32_0 = arith.constant 0 : i32
    %c0_i32_1 = arith.constant 0 : i32
    %c0_i32_2 = arith.constant 0 : i32
    return %c0_i32, %c0_i32_0, %c0_i32_1 : i32, i32, i32
  }
}

</mosaic_0001>

<bundles_post_ra>
// kernel: dilated_lstm_sequence.1
= control target key start
LH: loop header
LB: loop body
LE: loop exit
PB: predicated region body
PF: predicated region fallthrough
CT: control target
= control target key end

     0   :  { %s2954_s11 = smov 0   ;;  %s4096_s0 = inlined_call_operand.<no memory space> [shape: s32[1], index: 0, kind: input, shape index: {}]   ;;  %s4097_s1 = inlined_call_operand.vmem [shape: f32[12,8,64], index: 1, kind: input, shape index: {}]   ;;  %s4098_s2 = inlined_call_operand.vmem [shape: f32[4,8,128], index: 2, kind: input, shape index: {}, may-alias: {2,8}]   ;;  %s4099_s3 = inlined_call_operand.vmem [shape: f32[4,8,128], index: 3, kind: input, shape index: {}, may-alias: {3,9}]   ;;  %s4100_s4 = inlined_call_operand.vmem [shape: bf16[64,512], index: 4, kind: input, shape index: {}]   ;;  %s4101_s5 = inlined_call_operand.vmem [shape: bf16[128,512], index: 5, kind: input, shape index: {}]   ;;  %s4102_s6 = inlined_call_operand.vmem [shape: f32[1,512], index: 6, kind: input, shape index: {}]   ;;  %s4103_s7 = inlined_call_operand.vmem [shape: f32[12,8,128], index: 7, kind: output, shape index: {0}]   ;;  %s4104_s8 = inlined_call_operand.vmem [shape: f32[4,8,128], index: 8, kind: output, shape index: {1}, may-alias: {2,8}]   ;;  %s4105_s9 = inlined_call_operand.vmem [shape: f32[4,8,128], index: 9, kind: output, shape index: {2}, may-alias: {3,9}]  }
   0x1   :  { %15 = sst [smem:[#allocation4]] %s4096_s0 }
   0x2 LB: > { %s2045_s12 = sadd.s32 4294967295, %s2899_s11   ;;  %p2049_p0 = scmp.ge.s32.totalorder %s2899_s11, 1  ;;  %s2899_s11 = sphi %s2954_s11, %s21_s11  }
   0x3   : > { %p260_p1 = scmp.lt.s32.totalorder %s2899_s11, 4 }
   0x5   : > { %p261_p2 = pnand %p2049_p0, %p260_p1 }
   0x6   : > { %s2962_s13 = sshll.u32 (!%p261_p2), %s2045_s12, 2  ;;  %p2054_p4 = scmp.ne.s32.totalorder (!%p261_p2), %s2045_s12, 0 }
   0x7   : > { %264 = sbr.rel (%p261_p2) target bundleno = 886 (0x376), region = 44  ;;  %p295_p3 = scmp.lt.s32.totalorder (!%p261_p2), %s2962_s13, 11 }
   0xc   : > { %s296_s0 = scalar_select %p295_p3, %s2962_s13, 11 }
   0xd   : > { %310 = sbr.rel (%p2054_p4) target bundleno = 33 (0x21), region = 48 }
   0xe   : > { %s2051_s14 = sshll.u32 %s296_s0, 3 }
   0xf   : > { %s2969_s17 = scalar_lea.vmem %s4097_s1, %s2051_s14  ;;  %s2974_s20 = scalar_lea.vmem %s4103_s7, %s2051_s14 }
  0x12   : > { %v311_v0 = vld [vmem:[%s4098_s2] sm:$0xff]  ;;  %v312_v1 = vld [vmem:[%s4098_s2 + $0x8] sm:$0xff]  ;;  %v313_v2 = vld [vmem:[%s4098_s2 + $0x10] sm:$0xff] }
  0x13   : > { %315 = vst [vmem:[%s4104_s8] sm:$0xff] %v311_v0  ;;  %v319_v4 = vld [vmem:[%s4099_s3] sm:$0xff]  ;;  %v320_v5 = vld [vmem:[%s4099_s3 + $0x8] sm:$0xff]  ;;  %v321_v6 = vld [vmem:[%s4099_s3 + $0x10] sm:$0xff] }
  0x14   : > { %323 = vst [vmem:[%s4105_s9] sm:$0xff] %v319_v4 }
  0x1a   : > { %v314_v3 = vld [vmem:[%s4098_s2 + $0x18] sm:$0xff] }
  0x1b   : > { %316 = vst [vmem:[%s4104_s8 + $0x8] sm:$0xff] %v312_v1  ;;  %v322_v7 = vld [vmem:[%s4099_s3 + $0x18] sm:$0xff] }
  0x1c   : > { %317 = vst [vmem:[%s4104_s8 + $0x10] sm:$0xff] %v313_v2 }
  0x1d   : > { %318 = vst [vmem:[%s4104_s8 + $0x18] sm:$0xff] %v314_v3 }
  0x1e   : > { %324 = vst [vmem:[%s4105_s9 + $0x8] sm:$0xff] %v320_v5 }
  0x1f   : > { %325 = vst [vmem:[%s4105_s9 + $0x10] sm:$0xff] %v321_v6 }
  0x20   : > { %326 = vst [vmem:[%s4105_s9 + $0x18] sm:$0xff] %v322_v7 }
  0x21 PF: > { %v2105_v8 = vld [vmem:[%s4100_s4 + $0x60] sm:$0xf]  ;;  %v2691_v9 = vld [vmem:[%s4100_s4 + $0x6c] sm:$0xf0]  ;;  %v2689_v10 = vld [vmem:[%s4100_s4 + $0x64] sm:$0xf] }
  0x22   : > { %v2106_v11 = vor.u32 %v2691_v9, %v2105_v8  ;;  %v2107_v12 = vld [vmem:[%s4100_s4 + $0x70] sm:$0xf0]  ;;  %v2113_v13 = vld [vmem:[%s4100_s4 + $0x68] sm:$0xf]  ;;  %v2692_v14 = vld [vmem:[%s4100_s4 + $0x74] sm:$0xf0] }
  0x23   : > { %v2110_v15 = vor.u32 %v2689_v10, %v2107_v12  ;;  %v2114_v16 = vor.u32 %v2692_v14, %v2113_v13  ;;  %v2690_v17 = vld [vmem:[%s4100_s4 + $0x6c] sm:$0xf]  ;;  %v2115_v18 = vld [vmem:[%s4100_s4 + $0x78] sm:$0xf0]  ;;  %v2089_v19 = vld [vmem:[%s4100_s4 + $0x40] sm:$0xf] }
  0x24   : > { %440 = vmatpush.bf16.msra.mxu0 %v2106_v11  ;;  %v2118_v20 = vor.u32 %v2690_v17, %v2115_v18  ;;  %v2687_v21 = vld [vmem:[%s4100_s4 + $0x4c] sm:$0xf0]  ;;  %v2685_v22 = vld [vmem:[%s4100_s4 + $0x44] sm:$0xf]  ;;  %v2091_v23 = vld [vmem:[%s4100_s4 + $0x50] sm:$0xf0] }
  0x25   : > { %459 = vmatpush.bf16.msra.mxu1 %v2110_v15  ;;  %478 = vmatpush.bf16.msra.mxu2 %v2114_v16  ;;  %v2090_v24 = vor.u32 %v2687_v21, %v2089_v19  ;;  %v2094_v25 = vor.u32 %v2685_v22, %v2091_v23  ;;  %v2097_v26 = vld [vmem:[%s4100_s4 + $0x48] sm:$0xf]  ;;  %v2688_v27 = vld [vmem:[%s4100_s4 + $0x54] sm:$0xf0]  ;;  %v2686_v28 = vld [vmem:[%s4100_s4 + $0x4c] sm:$0xf] }
  0x26   : > { %497 = vmatpush.bf16.msra.mxu3 %v2118_v20  ;;  %v2098_v29 = vor.u32 %v2688_v27, %v2097_v26  ;;  %v2099_v30 = vld [vmem:[%s4100_s4 + $0x58] sm:$0xf0]  ;;  %v2073_v31 = vld [vmem:[%s4100_s4 + $0x20] sm:$0xf]  ;;  %v2683_v32 = vld [vmem:[%s4100_s4 + $0x2c] sm:$0xf0] }
  0x27   : > { %v2102_v33 = vor.u32 %v2686_v28, %v2099_v30  ;;  %v2681_v34 = vld [vmem:[%s4100_s4 + $0x24] sm:$0xf]  ;;  %v2075_v35 = vld [vmem:[%s4100_s4 + $0x30] sm:$0xf0]  ;;  %v2081_v36 = vld [vmem:[%s4100_s4 + $0x28] sm:$0xf]  ;;  %v2074_v37 = vor.u32 %v2683_v32, %v2073_v31 }
  0x28   : > { %441 = vmatpush.bf16.msra.mxu0 %v2090_v24  ;;  %v2684_v38 = vld [vmem:[%s4100_s4 + $0x34] sm:$0xf0]  ;;  %v2682_v39 = vld [vmem:[%s4100_s4 + $0x2c] sm:$0xf]  ;;  %v2083_v40 = vld [vmem:[%s4100_s4 + $0x38] sm:$0xf0]  ;;  %v2078_v41 = vor.u32 %v2681_v34, %v2075_v35 }
  0x29   : > { %460 = vmatpush.bf16.msra.mxu1 %v2094_v25  ;;  %479 = vmatpush.bf16.msra.mxu2 %v2098_v29  ;;  %v2082_v42 = vor.u32 %v2684_v38, %v2081_v36  ;;  %v2057_v43 = vld [vmem:[%s4100_s4] sm:$0xf]  ;;  %v2679_v44 = vld [vmem:[%s4100_s4 + $0xc] sm:$0xf0]  ;;  %v2677_v45 = vld [vmem:[%s4100_s4 + $0x4] sm:$0xf]  ;;  %v2086_v46 = vor.u32 %v2682_v39, %v2083_v40 }
  0x2a   : > { %498 = vmatpush.bf16.msra.mxu3 %v2102_v33  ;;  %v2059_v47 = vld [vmem:[%s4100_s4 + $0x10] sm:$0xf0]  ;;  %v2065_v48 = vld [vmem:[%s4100_s4 + $0x8] sm:$0xf]  ;;  %v2680_v49 = vld [vmem:[%s4100_s4 + $0x14] sm:$0xf0]  ;;  %v2058_v53 = vor.u32 %v2679_v44, %v2057_v43 }
  0x2b   : > { %v2678_v50 = vld [vmem:[%s4100_s4 + $0xc] sm:$0xf]  ;;  %v2067_v51 = vld [vmem:[%s4100_s4 + $0x18] sm:$0xf0]  ;;  %v327_v52 = vld [vmem:[%s2969_s17] sm:$0xff]  ;;  %v2062_v57 = vor.u32 %v2677_v45, %v2059_v47  ;;  %v2066_v58 = vor.u32 %v2680_v49, %v2065_v48  ;;  %vm429_vm0 = vcmask 523264  }
  0x2c   : > { %442 = vmatpush.bf16.msra.mxu0 %v2074_v37  ;;  %v328_v54 = vld [vmem:[%s2969_s17 + $0x8] sm:$0xff]  ;;  %v2246_v55 = vld [vmem:[%s4101_s5 + $0xe0] sm:$0xf]  ;;  %v2723_v56 = vld [vmem:[%s4101_s5 + $0xec] sm:$0xf0]  ;;  %v2070_v61 = vor.u32 %v2678_v50, %v2067_v51  ;;  %s3204_s25 = sld [smem:[#allocation4]] }
  0x2d   : > { %461 = vmatpush.bf16.msra.mxu1 %v2078_v41  ;;  %480 = vmatpush.bf16.msra.mxu2 %v2082_v42  ;;  %v2721_v59 = vld [vmem:[%s4101_s5 + $0xe4] sm:$0xf]  ;;  %v2248_v60 = vld [vmem:[%s4101_s5 + $0xf0] sm:$0xf0]  ;;  %v2247_v62 = vor.u32 %v2723_v56, %v2246_v55  ;;  %v2254_v63 = vld [vmem:[%s4101_s5 + $0xe8] sm:$0xf]  ;;  %v331_v2 = vpack.c.bf16 %v328_v54, %v327_v52 }
  0x2e   : > { %499 = vmatpush.bf16.msra.mxu3 %v2086_v46  ;;  %v2724_v0 = vld [vmem:[%s4101_s5 + $0xf4] sm:$0xf0]  ;;  %v2722_v1 = vld [vmem:[%s4101_s5 + $0xec] sm:$0xf]  ;;  %v2251_v3 = vor.u32 %v2721_v59, %v2248_v60  ;;  %v2256_v4 = vld [vmem:[%s4101_s5 + $0xf8] sm:$0xf0] }
  0x2f   : > { %v2230_v5 = vld [vmem:[%s4101_s5 + $0xc0] sm:$0xf]  ;;  %v2719_v6 = vld [vmem:[%s4101_s5 + $0xcc] sm:$0xf0]  ;;  %v2717_v7 = vld [vmem:[%s4101_s5 + $0xc4] sm:$0xf]  ;;  %v2255_v9 = vor.u32 %v2724_v0, %v2254_v63  ;;  %v2259_v10 = vor.u32 %v2722_v1, %v2256_v4 }
  0x30   : > { %443 = vmatpush.bf16.msra.mxu0 %v2058_v53  ;;  %v2232_v8 = vld [vmem:[%s4101_s5 + $0xd0] sm:$0xf0]  ;;  %v2231_v11 = vor.u32 %v2719_v6, %v2230_v5  ;;  %v2238_v12 = vld [vmem:[%s4101_s5 + $0xc8] sm:$0xf]  ;;  %v2720_v13 = vld [vmem:[%s4101_s5 + $0xd4] sm:$0xf0] }
  0x31   : > { %462 = vmatpush.bf16.msra.mxu1 %v2062_v57  ;;  %481 = vmatpush.bf16.msra.mxu2 %v2066_v58  ;;  %v2718_v14 = vld [vmem:[%s4101_s5 + $0xcc] sm:$0xf]  ;;  %v2235_v15 = vor.u32 %v2717_v7, %v2232_v8  ;;  %v2240_v16 = vld [vmem:[%s4101_s5 + $0xd8] sm:$0xf0]  ;;  %v2214_v17 = vld [vmem:[%s4101_s5 + $0xa0] sm:$0xf]  ;;  %v2239_v21 = vor.u32 %v2720_v13, %v2238_v12 }
  0x32   : > { %500 = vmatpush.bf16.msra.mxu3 %v2070_v61  ;;  %v2715_v18 = vld [vmem:[%s4101_s5 + $0xac] sm:$0xf0]  ;;  %v2713_v19 = vld [vmem:[%s4101_s5 + $0xa4] sm:$0xf]  ;;  %v2216_v20 = vld [vmem:[%s4101_s5 + $0xb0] sm:$0xf0]  ;;  %v2243_v23 = vor.u32 %v2718_v14, %v2240_v16  ;;  %s3258_s22 = sadd.s32 %s2962_s13, %s3204_s25 }
  0x33   : > { %2119 = vmatmul.msk.bf16.vlgmr.msra.gmra.mxu0 %vm429_vm0, %v331_v2  ;;  %v2222_v22 = vld [vmem:[%s4101_s5 + $0xa8] sm:$0xf]  ;;  %v2215_v24 = vor.u32 %v2715_v18, %v2214_v17  ;;  %v2716_v25 = vld [vmem:[%s4101_s5 + $0xb4] sm:$0xf0]  ;;  %v2714_v26 = vld [vmem:[%s4101_s5 + $0xac] sm:$0xf]  ;;  %v2219_v28 = vor.u32 %v2713_v19, %v2216_v20 }
  0x34   : > { %771 = vmatpush.bf16.msrb.mxu0 %v2247_v62  ;;  %2121 = vmatmul.msk.bf16.vlgmr.msra.gmra.mxu1 %vm429_vm0, %v331_v2  ;;  %v2224_v27 = vld [vmem:[%s4101_s5 + $0xb8] sm:$0xf0]  ;;  %v2198_v29 = vld [vmem:[%s4101_s5 + $0x80] sm:$0xf]  ;;  %v2711_v30 = vld [vmem:[%s4101_s5 + $0x8c] sm:$0xf0]  ;;  %v2223_v33 = vor.u32 %v2716_v25, %v2222_v22 }
  0x35   : > { %784 = vmatpush.bf16.msrb.mxu1 %v2251_v3  ;;  %2123 = vmatmul.msk.bf16.vlgmr.msra.gmra.mxu2 %vm429_vm0, %v331_v2  ;;  %v2709_v31 = vld [vmem:[%s4101_s5 + $0x84] sm:$0xf]  ;;  %v2200_v32 = vld [vmem:[%s4101_s5 + $0x90] sm:$0xf0]  ;;  %v2206_v34 = vld [vmem:[%s4101_s5 + $0x88] sm:$0xf]  ;;  %v2227_v35 = vor.u32 %v2714_v26, %v2224_v27  ;;  %v2199_v36 = vor.u32 %v2711_v30, %v2198_v29 }
  0x36   : > { %2125 = vmatmul.msk.bf16.vlgmr.msra.gmra.mxu3 %vm429_vm0, %v331_v2  ;;  %797 = vmatpush.bf16.msrb.mxu2 %v2255_v9  ;;  %v2712_v37 = vld [vmem:[%s4101_s5 + $0x94] sm:$0xf0]  ;;  %v2710_v38 = vld [vmem:[%s4101_s5 + $0x8c] sm:$0xf]  ;;  %v2208_v39 = vld [vmem:[%s4101_s5 + $0x98] sm:$0xf0]  ;;  %v2203_v40 = vor.u32 %v2709_v31, %v2200_v32 }
  0x37   : > { %810 = vmatpush.bf16.msrb.mxu3 %v2259_v10  ;;  %v329_v41 = vld [vmem:[%s2969_s17 + $0x10] sm:$0xff]  ;;  %v2182_v42 = vld [vmem:[%s4101_s5 + $0x60] sm:$0xf]  ;;  %v330_v44 = vld [vmem:[%s2969_s17 + $0x18] sm:$0xff]  ;;  %v2207_v47 = vor.u32 %v2712_v37, %v2206_v34  ;;  %v2211_v48 = vor.u32 %v2710_v38, %v2208_v39  ;;  %p557_p5 = scmp.lt.s32.totalorder %s3258_s22, 0  ;;  %s558_s12 = ssub.s32 0, %s3258_s22 }
  0x38   : > { %772 = vmatpush.bf16.msrb.mxu0 %v2231_v11  ;;  %v2707_v43 = vld [vmem:[%s4101_s5 + $0x6c] sm:$0xf0]  ;;  %v2705_v45 = vld [vmem:[%s4101_s5 + $0x64] sm:$0xf]  ;;  %v2184_v46 = vld [vmem:[%s4101_s5 + $0x70] sm:$0xf0]  ;;  %v332_v53 = vpack.c.bf16 %v330_v44, %v329_v41  ;;  %s2128_s21 = smin.u32 %s558_s12, %s3258_s22 }
  0x39   : > { %785 = vmatpush.bf16.msrb.mxu1 %v2235_v15  ;;  %v2183_v49 = vor.u32 %v2707_v43, %v2182_v42  ;;  %v2190_v50 = vld [vmem:[%s4101_s5 + $0x68] sm:$0xf]  ;;  %v2708_v51 = vld [vmem:[%s4101_s5 + $0x74] sm:$0xf0]  ;;  %v2706_v52 = vld [vmem:[%s4101_s5 + $0x6c] sm:$0xf]  ;;  %v2187_v54 = vor.u32 %v2705_v45, %v2184_v46 }
  0x3a   : > { %798 = vmatpush.bf16.msrb.mxu2 %v2239_v21  ;;  %v2192_v55 = vld [vmem:[%s4101_s5 + $0x78] sm:$0xf0]  ;;  %v2166_v56 = vld [vmem:[%s4101_s5 + $0x40] sm:$0xf]  ;;  %v2703_v57 = vld [vmem:[%s4101_s5 + $0x4c] sm:$0xf0]  ;;  %v2191_v60 = vor.u32 %v2708_v51, %v2190_v50 }
  0x3b   : > { %811 = vmatpush.bf16.msrb.mxu3 %v2243_v23  ;;  %v2701_v58 = vld [vmem:[%s4101_s5 + $0x44] sm:$0xf]  ;;  %v2168_v59 = vld [vmem:[%s4101_s5 + $0x50] sm:$0xf0]  ;;  %v2174_v61 = vld [vmem:[%s4101_s5 + $0x48] sm:$0xf]  ;;  %v2195_v62 = vor.u32 %v2706_v52, %v2192_v55  ;;  %v2167_v63 = vor.u32 %v2703_v57, %v2166_v56 }
  0x3c   : > { %773 = vmatpush.bf16.msrb.mxu0 %v2215_v24  ;;  %v2704_v0 = vld [vmem:[%s4101_s5 + $0x54] sm:$0xf0]  ;;  %v2702_v1 = vld [vmem:[%s4101_s5 + $0x4c] sm:$0xf]  ;;  %v2171_v2 = vor.u32 %v2701_v58, %v2168_v59  ;;  %v2176_v3 = vld [vmem:[%s4101_s5 + $0x58] sm:$0xf0] }
  0x3d   : > { %786 = vmatpush.bf16.msrb.mxu1 %v2219_v28  ;;  %v2150_v4 = vld [vmem:[%s4101_s5 + $0x20] sm:$0xf]  ;;  %v2699_v5 = vld [vmem:[%s4101_s5 + $0x2c] sm:$0xf0]  ;;  %v2697_v6 = vld [vmem:[%s4101_s5 + $0x24] sm:$0xf]  ;;  %v2175_v8 = vor.u32 %v2704_v0, %v2174_v61  ;;  %v2179_v9 = vor.u32 %v2702_v1, %v2176_v3 }
  0x3e   : > { %799 = vmatpush.bf16.msrb.mxu2 %v2223_v33  ;;  %v2152_v7 = vld [vmem:[%s4101_s5 + $0x30] sm:$0xf0]  ;;  %s560_s28 = sand.u32 3, %s2128_s21   ;;  %v2151_v10 = vor.u32 %v2699_v5, %v2150_v4  ;;  %v2158_v11 = vld [vmem:[%s4101_s5 + $0x28] sm:$0xf]  ;;  %p2263_p7 = scmp.ge.s32.totalorder %s2962_s13, 10 }
  0x3f   : > { %812 = vmatpush.bf16.msrb.mxu3 %v2227_v35  ;;  %s561_s29 = ssub.s32 0, %s560_s28  ;;  %v2700_v12 = vld [vmem:[%s4101_s5 + $0x34] sm:$0xf0]  ;;  %v2698_v13 = vld [vmem:[%s4101_s5 + $0x2c] sm:$0xf]  ;;  %v2155_v14 = vor.u32 %v2697_v6, %v2152_v7 }
  0x40   : > { %774 = vmatpush.bf16.msrb.mxu0 %v2199_v36  ;;  %s4107_s29 = smov (!%p557_p5, %s561_s29), %s560_s28  ;;  %v2160_v15 = vld [vmem:[%s4101_s5 + $0x38] sm:$0xf0]  ;;  %v2134_v16 = vld [vmem:[%s4101_s5] sm:$0xf]  ;;  %v2695_v17 = vld [vmem:[%s4101_s5 + $0xc] sm:$0xf0]  ;;  %v2159_v20 = vor.u32 %v2700_v12, %v2158_v11 }
  0x41   : > { %787 = vmatpush.bf16.msrb.mxu1 %v2203_v40  ;;  %v2693_v18 = vld [vmem:[%s4101_s5 + $0x4] sm:$0xf]  ;;  %v2136_v19 = vld [vmem:[%s4101_s5 + $0x10] sm:$0xf0]  ;;  %p2130_p6 = scmp.lt.s32.totalorder %s4107_s29, 0  ;;  %s567_s28 = sadd.s32 4, %s4107_s29  ;;  %v2163_v21 = vor.u32 %v2698_v13, %v2160_v15  ;;  %v2135_v22 = vor.u32 %v2695_v17, %v2134_v16 }
  0x42   : > { %800 = vmatpush.bf16.msrb.mxu2 %v2207_v47  ;;  %v2142_v23 = vld [vmem:[%s4101_s5 + $0x8] sm:$0xf]  ;;  %v2696_v24 = vld [vmem:[%s4101_s5 + $0x14] sm:$0xf0]  ;;  %v2139_v25 = vor.u32 %v2693_v18, %v2136_v19  ;;  %v2694_v26 = vld [vmem:[%s4101_s5 + $0xc] sm:$0xf] }
  0x43   : > { %813 = vmatpush.bf16.msrb.mxu3 %v2211_v48  ;;  %2120 = vmatmul.msk.bf16.gmra.mxu0 %vm429_vm0, %v332_v53  ;;  %s4109_s28 = smov (!%p2130_p6, %s567_s28), %s4107_s29  ;;  %v2144_v27 = vld [vmem:[%s4101_s5 + $0x18] sm:$0xf0]  ;;  %v2143_v28 = vor.u32 %v2696_v24, %v2142_v23  ;;  %v512_v32 = vld [vmem:[%s4102_s6] sm:$0xf] }
  0x44   : > { %775 = vmatpush.bf16.msrb.mxu0 %v2183_v49  ;;  %2122 = vmatmul.msk.bf16.gmra.mxu1 %vm429_vm0, %v332_v53  ;;  %s2131_s16 = sshll.u32 %s4109_s28, 3  ;;  %v2147_v29 = vor.u32 %v2694_v26, %v2144_v27  ;;  %v514_v33 = vperm.slane %v512_v32, 0  ;;  %v515_v34 = vperm.slane %v512_v32, 1  ;;  %v516_v39 = vperm.slane %v512_v32, 2 }
  0x45   : > { %788 = vmatpush.bf16.msrb.mxu1 %v2187_v54  ;;  %2124 = vmatmul.msk.bf16.gmra.mxu2 %vm429_vm0, %v332_v53  ;;  %s3343_s29 = scalar_lea.vmem %s4104_s8, %s2131_s16  ;;  %v517_v40 = vperm.slane %v512_v32, 3  ;;  %s3357_s27 = scalar_lea.vmem %s4105_s9, %s2131_s16 }
  0x46   : > { %2126 = vmatmul.msk.bf16.gmra.mxu3 %vm429_vm0, %v332_v53  ;;  %801 = vmatpush.bf16.msrb.mxu2 %v2191_v60  ;;  %v571_v30 = vld [vmem:[%s3343_s29] sm:$0xff] }
  0x47   : > { %814 = vmatpush.bf16.msrb.mxu3 %v2195_v62  ;;  %v578_v31 = vpack.c.bf16 %v571_v30, %v571_v30 }
  0x48   : > { %776 = vmatpush.bf16.msrb.mxu0 %v2167_v63 }
  0x49   : > { %789 = vmatpush.bf16.msrb.mxu1 %v2171_v2 }
  0x4a   : > { %802 = vmatpush.bf16.msrb.mxu2 %v2175_v8 }
  0x4b   : > { %815 = vmatpush.bf16.msrb.mxu3 %v2179_v9 }
  0x4c   : > { %777 = vmatpush.bf16.msrb.mxu0 %v2151_v10 }
  0x4d   : > { %790 = vmatpush.bf16.msrb.mxu1 %v2155_v14 }
  0x4e   : > { %803 = vmatpush.bf16.msrb.mxu2 %v2159_v20 }
  0x4f   : > { %816 = vmatpush.bf16.msrb.mxu3 %v2163_v21 }
  0x50   : > { %778 = vmatpush.bf16.msrb.mxu0 %v2135_v22 }
  0x51   : > { %791 = vmatpush.bf16.msrb.mxu1 %v2139_v25 }
  0x52   : > { %804 = vmatpush.bf16.msrb.mxu2 %v2143_v28 }
  0x53   : > { %817 = vmatpush.bf16.msrb.mxu3 %v2147_v29  ;;  %779 = vmatmul.bf16.vlgmr.msrb.gmra.mxu0 %v578_v31 }
  0x54   : > { %792 = vmatmul.bf16.vlgmr.msrb.gmra.mxu1 %v578_v31 }
  0x55   : > { %805 = vmatmul.bf16.vlgmr.msrb.gmra.mxu2 %v578_v31 }
  0x56   : > { %818 = vmatmul.bf16.vlgmr.msrb.gmra.mxu3 %v578_v31 }
  0xb0   : > { %v445_v35 = vpop.f32.mrf.mxu0 }
  0xb1   : > { %v522_v36 = vadd.f32 %v514_v33, %v445_v35  ;;  %v464_v37 = vpop.f32.mrf.mxu1 }
  0xb2   : > { %v523_v38 = vadd.f32 %v515_v34, %v464_v37 }
  0xb8   : > { %v483_v41 = vpop.f32.mrf.mxu2  ;;  %v447_v44 = vpop.f32.mrf.mxu0 }
  0xb9   : > { %v3349_v42 = vadd.f32 %v516_v39, %v483_v41  ;;  %v502_v43 = vpop.f32.mrf.mxu3  ;;  %v526_v46 = vadd.f32 %v514_v33, %v447_v44  ;;  %v466_v47 = vpop.f32.mrf.mxu1 }
  0xba   : > { %v525_v45 = vadd.f32 %v517_v40, %v502_v43  ;;  %v527_v48 = vadd.f32 %v515_v34, %v466_v47 }
  0xbb   : > { %542 = vst [vmem:[#allocation2 + $0x50] sm:$0xff] %v526_v46 }
  0xbc   : > { %543 = vst [vmem:[#allocation2 + $0x68] sm:$0xff] %v527_v48 }
  0xc0   : > { %v485_v49 = vpop.f32.mrf.mxu2  ;;  %v450_v52 = vpop.f32.mrf.mxu0 }
  0xc1   : > { %v528_v50 = vadd.f32 %v516_v39, %v485_v49  ;;  %v504_v51 = vpop.f32.mrf.mxu3  ;;  %v530_v54 = vadd.f32 %v514_v33, %v450_v52  ;;  %v469_v55 = vpop.f32.mrf.mxu1 }
  0xc2   : > { %v529_v53 = vadd.f32 %v517_v40, %v504_v51  ;;  %v531_v56 = vadd.f32 %v515_v34, %v469_v55 }
  0xc3   : > { %544 = vst [vmem:[#allocation2 + $0x8] sm:$0xff] %v528_v50 }
  0xc4   : > { %545 = vst [vmem:[#allocation2 + $0x48] sm:$0xff] %v529_v53 }
  0xc5   : > { %546 = vst [vmem:[#allocation2 + $0x40] sm:$0xff] %v530_v54 }
  0xc6   : > { %547 = vst [vmem:[#allocation2 + $0x20] sm:$0xff] %v531_v56 }
  0xc8   : > { %v488_v57 = vpop.f32.mrf.mxu2  ;;  %v452_v60 = vpop.f32.mrf.mxu0 }
  0xc9   : > { %v532_v58 = vadd.f32 %v516_v39, %v488_v57  ;;  %v507_v59 = vpop.f32.mrf.mxu3  ;;  %v534_v62 = vadd.f32 %v514_v33, %v452_v60  ;;  %v471_v63 = vpop.f32.mrf.mxu1 }
  0xca   : > { %v533_v61 = vadd.f32 %v517_v40, %v507_v59  ;;  %v535_v0 = vadd.f32 %v515_v34, %v471_v63 }
  0xcb   : > { %548 = vst [vmem:[#allocation2 + $0x10] sm:$0xff] %v532_v58 }
  0xcc   : > { %549 = vst [vmem:[#allocation2 + $0x38] sm:$0xff] %v533_v61 }
  0xcd   : > { %550 = vst [vmem:[#allocation2 + $0x60] sm:$0xff] %v534_v62 }
  0xce   : > { %551 = vst [vmem:[#allocation2 + $0x70] sm:$0xff] %v535_v0 }
  0xd0   : > { %v490_v1 = vpop.f32.mrf.mxu2  ;;  %v780_v4 = vpop.f32.mrf.mxu0 }
  0xd1   : > { %v536_v2 = vadd.f32 %v516_v39, %v490_v1  ;;  %v509_v3 = vpop.f32.mrf.mxu3  ;;  %v823_v6 = vadd.f32 %v780_v4, %v522_v36  ;;  %v793_v7 = vpop.f32.mrf.mxu1 }
  0xd2   : > { %v537_v5 = vadd.f32 %v517_v40, %v509_v3  ;;  %v824_v8 = vadd.f32 %v793_v7, %v523_v38 }
  0xd3   : > { %552 = vst [vmem:[#allocation2 + $0x78] sm:$0xff] %v536_v2  ;;  %v2260_v9 = vmul.f32 -1.442695, %v823_v6 }
  0xd4   : > { %553 = vst [vmem:[#allocation2 + $0x28] sm:$0xff] %v537_v5  ;;  %v2261_v10 = vmul.f32 -1.442695, %v824_v8 }
  0xd5   : > { %2829 = vpow2.f32 %v2260_v9 }
  0xd6   : > { %2831 = vpow2.f32 %v2261_v10 }
  0xd8   : > { %v806_v11 = vpop.f32.mrf.mxu2  ;;  %v782_v13 = vpop.f32.mrf.mxu0 }
  0xd9   : > { %v819_v12 = vpop.f32.mrf.mxu3  ;;  %v795_v15 = vpop.f32.mrf.mxu1  ;;  %v825_v25 = vadd.f32 %v806_v11, %v3349_v42  ;;  %v573_v42 = vld [vmem:[%s3357_s27] sm:$0xff] }
  0xda   : > { %v826_v14 = vadd.f32 %v819_v12, %v525_v45 }
  0xdb   : > { %v2830_v16 = vpop.eup %2829 }
  0xdc   : > { %v2262_v17 = vmul.f32 -1.442695, %v826_v14  ;;  %v2832_v18 = vpop.eup %2831  ;;  %v830_v19 = vadd.f32 1.0, %v2830_v16 }
  0xdd   : > { %v849_v20 = vadd.f32 1.0, %v2832_v18 }
  0xde   : > { %2833 = vpow2.f32 %v2262_v17  ;;  %v842_v32 = vand.u32 2147483648, %v830_v19  ;;  %v840_v35 = vand.u32 2147483647, %v830_v19  ;;  %vm836_vm3 = vweird.f32 %v830_v19 }
  0xdf   : > { %2835 = vrcp.f32 %v830_v19  ;;  %v861_v33 = vand.u32 2147483648, %v849_v20  ;;  %v859_v37 = vand.u32 2147483647, %v849_v20  ;;  %vm855_vm4 = vweird.f32 %v849_v20 }
  0xe0   : > { %2837 = vrcp.f32 %v849_v20  ;;  %v808_v21 = vpop.f32.mrf.mxu2  ;;  %v843_v40 = vor.u32 1.1754944e-38, %v842_v32  ;;  %vm841_vm7 = vcmp.eq.f32.partialorder %v840_v35, 8.507059e+37 }
  0xe1   : > { %v821_v22 = vpop.f32.mrf.mxu3  ;;  %v862_v43 = vor.u32 1.1754944e-38, %v861_v33  ;;  %vm860_vm8 = vcmp.eq.f32.partialorder %v859_v37, 8.507059e+37 }
  0xe4   : > { %v2834_v23 = vpop.eup %2833 }
  0xe5   : > { %v2836_v24 = vpop.eup %2835  ;;  %v869_v26 = vadd.f32 1.0, %v2834_v23 }
  0xe6   : > { %v2838_v27 = vpop.eup %2837  ;;  %v832_v28 = vmul.f32 %v2836_v24, %v830_v19  ;;  %vm837_vm1 = vweird.f32 %v2836_v24 }
  0xe7   : > { %v851_v29 = vmul.f32 %v2838_v27, %v849_v20  ;;  %2839 = vrcp.f32 %v869_v26  ;;  %vm856_vm2 = vweird.f32 %v2838_v27  ;;  %vm838_vm5 = vmor %vm836_vm3, %vm837_vm1  ;;  %v881_v56 = vand.u32 2147483648, %v869_v26 }
  0xe8   : > { %v833_v30 = vsub.f32 1.0, %v832_v28  ;;  %2841 = vtanh.f32 %v825_v25  ;;  %vm857_vm6 = vmor %vm855_vm4, %vm856_vm2  ;;  %vm875_vm10 = vweird.f32 %v869_v26  ;;  %v879_v57 = vand.u32 2147483647, %v869_v26 }
  0xe9   : > { %v852_v31 = vsub.f32 1.0, %v851_v29  ;;  %v882_v59 = vor.u32 1.1754944e-38, %v881_v56 }
  0xea   : > { %v834_v34 = vmul.f32 %v2836_v24, %v833_v30  ;;  %vm880_vm12 = vcmp.eq.f32.partialorder %v879_v57, 8.507059e+37 }
  0xeb   : > { %v853_v36 = vmul.f32 %v2838_v27, %v852_v31 }
  0xec   : > { %v835_v38 = vadd.f32 %v2836_v24, %v834_v34 }
  0xed   : > { %v2840_v39 = vpop.eup %2839  ;;  %v854_v41 = vadd.f32 %v2838_v27, %v853_v36 }
  0xee   : > { %v839_v44 = vsel %vm838_vm5, %v2836_v24, %v835_v38  ;;  %v871_v45 = vmul.f32 %v2840_v39, %v869_v26  ;;  %v2842_v46 = vpop.eup %2841  ;;  %vm876_vm9 = vweird.f32 %v2840_v39 }
  0xef   : > { %v844_v47 = vsel %vm841_vm7, %v843_v40, %v839_v44  ;;  %v858_v48 = vsel %vm857_vm6, %v2838_v27, %v854_v41  ;;  %vm877_vm11 = vmor %vm875_vm10, %vm876_vm9 }
  0xf0   : > { %v863_v49 = vsel %vm860_vm8, %v862_v43, %v858_v48  ;;  %v886_v50 = vmul.f32 %v2842_v46, %v844_v47  ;;  %v872_v51 = vsub.f32 1.0, %v871_v45 }
  0xf1   : > { %v885_v52 = vmul.f32 %v863_v49, %v573_v42 }
  0xf2   : > { %v873_v53 = vmul.f32 %v2840_v39, %v872_v51 }
  0xf3   : > { %v887_v54 = vadd.f32 %v886_v50, %v885_v52 }
  0xf4   : > { %v874_v55 = vadd.f32 %v2840_v39, %v873_v53 }
  0xf5   : > { %2843 = vtanh.f32 %v887_v54 }
  0xf6   : > { %v878_v58 = vsel %vm877_vm11, %v2840_v39, %v874_v55 }
  0xf7   : > { %v883_v61 = vsel %vm880_vm12, %v882_v59, %v878_v58 }
  0xf8   : > { %893 = sbr.rel (%p2263_p7) target bundleno = 255 (0xff), region = 52 }
  0xfb   : > { %v2844_v60 = vpop.eup %2843 }
  0xfc   : > { %v889_v62 = vmul.f32 %v2844_v60, %v883_v61 }
  0xfd   : > { %895 = vst [vmem:[%s3357_s27] sm:$0xff] %v887_v54 }
  0xfe   : > { %894 = vst [vmem:[%s3343_s29] sm:$0xff] %v889_v62 }
  0xff PF: > { %v2382_v4 = vld [vmem:[%s4101_s5 + $0xe0] sm:$0xf]  ;;  %v2755_v5 = vld [vmem:[%s4101_s5 + $0xec] sm:$0xf0]  ;;  %v2753_v7 = vld [vmem:[%s4101_s5 + $0xe4] sm:$0xf] }
 0x100   : > { %v2383_v6 = vor.u32 %v2755_v5, %v2382_v4  ;;  %v2384_v8 = vld [vmem:[%s4101_s5 + $0xf0] sm:$0xf0]  ;;  %v2754_v9 = vld [vmem:[%s4101_s5 + $0xec] sm:$0xf]  ;;  %v2392_v12 = vld [vmem:[%s4101_s5 + $0xf8] sm:$0xf0] }
 0x101   : > { %v2387_v11 = vor.u32 %v2753_v7, %v2384_v8  ;;  %v2366_v13 = vld [vmem:[%s4101_s5 + $0xc0] sm:$0xf]  ;;  %v2751_v14 = vld [vmem:[%s4101_s5 + $0xcc] sm:$0xf0]  ;;  %v2395_v15 = vor.u32 %v2754_v9, %v2392_v12  ;;  %v2749_v17 = vld [vmem:[%s4101_s5 + $0xc4] sm:$0xf] }
 0x102   : > { %1121 = vmatpush.bf16.msra.mxu0 %v2383_v6  ;;  %v2367_v16 = vor.u32 %v2751_v14, %v2366_v13  ;;  %v2368_v18 = vld [vmem:[%s4101_s5 + $0xd0] sm:$0xf0]  ;;  %v2750_v19 = vld [vmem:[%s4101_s5 + $0xcc] sm:$0xf]  ;;  %v2376_v22 = vld [vmem:[%s4101_s5 + $0xd8] sm:$0xf0] }
 0x103   : > { %1134 = vmatpush.bf16.msra.mxu1 %v2387_v11  ;;  %v2371_v21 = vor.u32 %v2749_v17, %v2368_v18  ;;  %v2390_v23 = vld [vmem:[%s4101_s5 + $0xe8] sm:$0xf]  ;;  %v2756_v24 = vld [vmem:[%s4101_s5 + $0xf4] sm:$0xf0]  ;;  %1160 = vmatpush.bf16.msra.mxu3 %v2395_v15  ;;  %v2379_v25 = vor.u32 %v2750_v19, %v2376_v22  ;;  %v2350_v27 = vld [vmem:[%s4101_s5 + $0xa0] sm:$0xf] }
 0x104   : > { %v2391_v26 = vor.u32 %v2756_v24, %v2390_v23  ;;  %v2747_v28 = vld [vmem:[%s4101_s5 + $0xac] sm:$0xf0]  ;;  %v2745_v29 = vld [vmem:[%s4101_s5 + $0xa4] sm:$0xf]  ;;  %v2352_v31 = vld [vmem:[%s4101_s5 + $0xb0] sm:$0xf0] }
 0x105   : > { %v896_v63 = vld [vmem:[%s4104_s8] sm:$0xff]  ;;  %v897_v0 = vld [vmem:[%s4104_s8 + $0x8] sm:$0xff]  ;;  %v898_v1 = vld [vmem:[%s4104_s8 + $0x10] sm:$0xff]  ;;  %v2351_v33 = vor.u32 %v2747_v28, %v2350_v27  ;;  %v2355_v37 = vor.u32 %v2745_v29, %v2352_v31  ;;  %s3467_s23 = sadd.s32 1, %s3258_s22 }
 0x106   : > { %v899_v2 = vld [vmem:[%s4104_s8 + $0x18] sm:$0xff]  ;;  %v900_v3 = vadd.f32 %v897_v0, %v896_v63  ;;  %v2746_v32 = vld [vmem:[%s4101_s5 + $0xac] sm:$0xf]  ;;  %1122 = vmatpush.bf16.msra.mxu0 %v2367_v16  ;;  %1147 = vmatpush.bf16.msra.mxu2 %v2391_v26  ;;  %v2374_v35 = vld [vmem:[%s4101_s5 + $0xc8] sm:$0xf]  ;;  %s907_s21 = ssub.s32 0, %s3467_s23 }
 0x107   : > { %v2360_v34 = vld [vmem:[%s4101_s5 + $0xb8] sm:$0xf0]  ;;  %v2752_v36 = vld [vmem:[%s4101_s5 + $0xd4] sm:$0xf0]  ;;  %1135 = vmatpush.bf16.msra.mxu1 %v2371_v21  ;;  %v2334_v39 = vld [vmem:[%s4101_s5 + $0x80] sm:$0xf]  ;;  %1161 = vmatpush.bf16.msra.mxu3 %v2379_v25  ;;  %s2264_s16 = smin.u32 %s907_s21, %s3467_s23 }
 0x108   : > { %v901_v10 = vadd.f32 %v900_v3, %v898_v1  ;;  %v2375_v38 = vor.u32 %v2752_v36, %v2374_v35  ;;  %v2743_v40 = vld [vmem:[%s4101_s5 + $0x8c] sm:$0xf0]  ;;  %v2363_v41 = vor.u32 %v2746_v32, %v2360_v34  ;;  %v2741_v42 = vld [vmem:[%s4101_s5 + $0x84] sm:$0xf]  ;;  %v2336_v43 = vld [vmem:[%s4101_s5 + $0x90] sm:$0xf0] }
 0x109   : > { %v2742_v44 = vld [vmem:[%s4101_s5 + $0x8c] sm:$0xf]  ;;  %v2344_v45 = vld [vmem:[%s4101_s5 + $0x98] sm:$0xf0]  ;;  %v2358_v46 = vld [vmem:[%s4101_s5 + $0xa8] sm:$0xf]  ;;  %v2335_v48 = vor.u32 %v2743_v40, %v2334_v39  ;;  %v2339_v50 = vor.u32 %v2741_v42, %v2336_v43 }
 0x10a   : > { %v902_v20 = vadd.f32 %v901_v10, %v899_v2  ;;  %v2748_v47 = vld [vmem:[%s4101_s5 + $0xb4] sm:$0xf0]  ;;  %1123 = vmatpush.bf16.msra.mxu0 %v2351_v33  ;;  %1148 = vmatpush.bf16.msra.mxu2 %v2375_v38  ;;  %v2318_v51 = vld [vmem:[%s4101_s5 + $0x60] sm:$0xf]  ;;  %v2739_v52 = vld [vmem:[%s4101_s5 + $0x6c] sm:$0xf0]  ;;  %v2347_v54 = vor.u32 %v2742_v44, %v2344_v45 }
 0x10b   : > { %v2359_v49 = vor.u32 %v2748_v47, %v2358_v46  ;;  %1136 = vmatpush.bf16.msra.mxu1 %v2355_v37  ;;  %v2342_v53 = vld [vmem:[%s4101_s5 + $0x88] sm:$0xf]  ;;  %1162 = vmatpush.bf16.msra.mxu3 %v2363_v41  ;;  %v2737_v55 = vld [vmem:[%s4101_s5 + $0x64] sm:$0xf]  ;;  %v2320_v56 = vld [vmem:[%s4101_s5 + $0x70] sm:$0xf0]  ;;  %v2319_v60 = vor.u32 %v2739_v52, %v2318_v51 }
 0x10c   : > { %v903_v30 = vmul.f32 0.25, %v902_v20  ;;  %v2744_v57 = vld [vmem:[%s4101_s5 + $0x94] sm:$0xf0]  ;;  %v2738_v58 = vld [vmem:[%s4101_s5 + $0x6c] sm:$0xf]  ;;  %v2323_v63 = vor.u32 %v2737_v55, %v2320_v56  ;;  %p906_p8 = scmp.lt.s32.totalorder %s3467_s23, 0 }
 0x10d   : > { %v2328_v59 = vld [vmem:[%s4101_s5 + $0x78] sm:$0xf0]  ;;  %v2343_v61 = vor.u32 %v2744_v57, %v2342_v53  ;;  %v2302_v62 = vld [vmem:[%s4101_s5 + $0x40] sm:$0xf]  ;;  %v2735_v0 = vld [vmem:[%s4101_s5 + $0x4c] sm:$0xf0] }
 0x10e   : > { %904 = vst [vmem:[%s2974_s20] sm:$0xff] %v903_v30  ;;  %1124 = vmatpush.bf16.msra.mxu0 %v2335_v48  ;;  %1149 = vmatpush.bf16.msra.mxu2 %v2359_v49  ;;  %v2326_v1 = vld [vmem:[%s4101_s5 + $0x68] sm:$0xf]  ;;  %v2740_v2 = vld [vmem:[%s4101_s5 + $0x74] sm:$0xf0]  ;;  %v2331_v3 = vor.u32 %v2738_v58, %v2328_v59  ;;  %v2733_v4 = vld [vmem:[%s4101_s5 + $0x44] sm:$0xf]  ;;  %v2303_v8 = vor.u32 %v2735_v0, %v2302_v62 }
 0x10f   : > { %1137 = vmatpush.bf16.msra.mxu1 %v2339_v50  ;;  %1163 = vmatpush.bf16.msra.mxu3 %v2347_v54  ;;  %v2304_v5 = vld [vmem:[%s4101_s5 + $0x50] sm:$0xf0]  ;;  %v2734_v6 = vld [vmem:[%s4101_s5 + $0x4c] sm:$0xf]  ;;  %v2312_v7 = vld [vmem:[%s4101_s5 + $0x58] sm:$0xf0]  ;;  %v2327_v9 = vor.u32 %v2740_v2, %v2326_v1 }
 0x110   : > { %v2286_v10 = vld [vmem:[%s4101_s5 + $0x20] sm:$0xf]  ;;  %v2731_v11 = vld [vmem:[%s4101_s5 + $0x2c] sm:$0xf0]  ;;  %v2307_v12 = vor.u32 %v2733_v4, %v2304_v5  ;;  %v2310_v13 = vld [vmem:[%s4101_s5 + $0x48] sm:$0xf]  ;;  %v2315_v15 = vor.u32 %v2734_v6, %v2312_v7 }
 0x111   : > { %v2736_v14 = vld [vmem:[%s4101_s5 + $0x54] sm:$0xf0]  ;;  %s909_s12 = sand.u32 3, %s2264_s16   ;;  %v2729_v16 = vld [vmem:[%s4101_s5 + $0x24] sm:$0xf]  ;;  %v2287_v20 = vor.u32 %v2731_v11, %v2286_v10  ;;  %v924_v41 = vld [vmem:[#allocation2 + $0x50] sm:$0xff] }
 0x112   : > { %1125 = vmatpush.bf16.msra.mxu0 %v2319_v60  ;;  %1150 = vmatpush.bf16.msra.mxu2 %v2343_v61  ;;  %v2288_v17 = vld [vmem:[%s4101_s5 + $0x30] sm:$0xf0]  ;;  %s910_s19 = ssub.s32 0, %s909_s12  ;;  %v2730_v18 = vld [vmem:[%s4101_s5 + $0x2c] sm:$0xf]  ;;  %v2311_v21 = vor.u32 %v2736_v14, %v2310_v13 }
 0x113   : > { %1138 = vmatpush.bf16.msra.mxu1 %v2323_v63  ;;  %1164 = vmatpush.bf16.msra.mxu3 %v2331_v3  ;;  %v2296_v19 = vld [vmem:[%s4101_s5 + $0x38] sm:$0xf0]  ;;  %s4111_s19 = smov (!%p906_p8, %s910_s19), %s909_s12  ;;  %v2270_v22 = vld [vmem:[%s4101_s5] sm:$0xf]  ;;  %v2727_v23 = vld [vmem:[%s4101_s5 + $0xc] sm:$0xf0]  ;;  %v2291_v24 = vor.u32 %v2729_v16, %v2288_v17 }
 0x114   : > { %p2266_p9 = scmp.lt.s32.totalorder %s4111_s19, 0  ;;  %s916_s30 = sadd.s32 4, %s4111_s19  ;;  %v2294_v25 = vld [vmem:[%s4101_s5 + $0x28] sm:$0xf]  ;;  %v2732_v26 = vld [vmem:[%s4101_s5 + $0x34] sm:$0xf0]  ;;  %v2299_v27 = vor.u32 %v2730_v18, %v2296_v19  ;;  %v2271_v32 = vor.u32 %v2727_v23, %v2270_v22 }
 0x115   : > { %v2725_v28 = vld [vmem:[%s4101_s5 + $0x4] sm:$0xf]  ;;  %v2272_v29 = vld [vmem:[%s4101_s5 + $0x10] sm:$0xf0]  ;;  %v2726_v30 = vld [vmem:[%s4101_s5 + $0xc] sm:$0xf]  ;;  %v2295_v33 = vor.u32 %v2732_v26, %v2294_v25 }
 0x116   : > { %1126 = vmatpush.bf16.msra.mxu0 %v2303_v8  ;;  %1151 = vmatpush.bf16.msra.mxu2 %v2327_v9  ;;  %v2280_v31 = vld [vmem:[%s4101_s5 + $0x18] sm:$0xf0]  ;;  %s4113_s30 = smov (!%p2266_p9, %s916_s30), %s4111_s19  ;;  %v2275_v34 = vor.u32 %v2725_v28, %v2272_v29  ;;  %v2278_v35 = vld [vmem:[%s4101_s5 + $0x8] sm:$0xf]  ;;  %v2728_v36 = vld [vmem:[%s4101_s5 + $0x14] sm:$0xf0] }
 0x117   : > { %1139 = vmatpush.bf16.msra.mxu1 %v2307_v12  ;;  %1165 = vmatpush.bf16.msra.mxu3 %v2315_v15  ;;  %s2267_s16 = sshll.u32 %s4113_s30, 3  ;;  %v2283_v37 = vor.u32 %v2726_v30, %v2280_v31  ;;  %v2279_v40 = vor.u32 %v2728_v36, %v2278_v35  ;;  %s1240_s12 = sadd.s32 1, %s2962_s13  ;;  %v925_v42 = vld [vmem:[#allocation2 + $0x68] sm:$0xff] }
 0x118   : > { %s3584_s23 = scalar_lea.vmem %s4104_s8, %s2267_s16  ;;  %v927_v49 = vld [vmem:[#allocation2 + $0x48] sm:$0xff]  ;;  %s3593_s15 = scalar_lea.vmem %s4105_s9, %s2267_s16 }
 0x119   : > { %v920_v38 = vld [vmem:[%s3584_s23] sm:$0xff]  ;;  %v926_v60 = vld [vmem:[#allocation2 + $0x8] sm:$0xff]  ;;  %p2399_p10 = scmp.ge.s32.totalorder %s1240_s12, 10 }
 0x11a   : > { %1127 = vmatpush.bf16.msra.mxu0 %v2287_v20  ;;  %1152 = vmatpush.bf16.msra.mxu2 %v2311_v21  ;;  %v928_v39 = vpack.c.bf16 %v920_v38, %v920_v38  ;;  %v922_v19 = vld [vmem:[%s3593_s15] sm:$0xff] }
 0x11b   : > { %1140 = vmatpush.bf16.msra.mxu1 %v2291_v24  ;;  %1166 = vmatpush.bf16.msra.mxu3 %v2299_v27 }
 0x11e   : > { %1128 = vmatpush.bf16.msra.mxu0 %v2271_v32  ;;  %1153 = vmatpush.bf16.msra.mxu2 %v2295_v33 }
 0x11f   : > { %1141 = vmatpush.bf16.msra.mxu1 %v2275_v34  ;;  %1167 = vmatpush.bf16.msra.mxu3 %v2283_v37 }
 0x121   : > { %1129 = vmatmul.bf16.vlgmr.msra.gmra.mxu0 %v928_v39 }
 0x122   : > { %1142 = vmatmul.bf16.vlgmr.msra.gmra.mxu1 %v928_v39  ;;  %1154 = vmatpush.bf16.msra.mxu2 %v2279_v40 }
 0x123   : > { %1168 = vmatmul.bf16.vlgmr.msra.gmra.mxu3 %v928_v39 }
 0x125   : > { %1155 = vmatmul.bf16.vlgmr.msra.gmra.mxu2 %v928_v39 }
 0x19e   : > { %v1130_v43 = vpop.f32.mrf.mxu0 }
 0x19f   : > { %v1173_v44 = vadd.f32 %v1130_v43, %v924_v41  ;;  %v1143_v45 = vpop.f32.mrf.mxu1 }
 0x1a0   : > { %v1174_v46 = vadd.f32 %v1143_v45, %v925_v42 }
 0x1a1   : > { %v2396_v47 = vmul.f32 -1.442695, %v1173_v44 }
 0x1a2   : > { %v2397_v48 = vmul.f32 -1.442695, %v1174_v46 }
 0x1a3   : > { %2845 = vpow2.f32 %v2396_v47 }
 0x1a4   : > { %2847 = vpow2.f32 %v2397_v48 }
 0x1a6   : > { %v1169_v50 = vpop.f32.mrf.mxu3  ;;  %v1132_v51 = vpop.f32.mrf.mxu0 }
 0x1a7   : > { %v1176_v52 = vadd.f32 %v1169_v50, %v927_v49  ;;  %v1145_v53 = vpop.f32.mrf.mxu1 }
 0x1a8   : > { %v1156_v54 = vpop.f32.mrf.mxu2 }
 0x1a9   : > { %v2846_v55 = vpop.eup %2845  ;;  %v2398_v56 = vmul.f32 -1.442695, %v1176_v52  ;;  %v1175_v62 = vadd.f32 %v1156_v54, %v926_v60 }
 0x1aa   : > { %v2848_v57 = vpop.eup %2847  ;;  %v1180_v58 = vadd.f32 1.0, %v2846_v55 }
 0x1ab   : > { %v1199_v59 = vadd.f32 1.0, %v2848_v57  ;;  %2849 = vpow2.f32 %v2398_v56 }
 0x1ac   : > { %2851 = vrcp.f32 %v1180_v58  ;;  %v1192_v8 = vand.u32 2147483648, %v1180_v58  ;;  %v1190_v11 = vand.u32 2147483647, %v1180_v58  ;;  %vm1186_vm15 = vweird.f32 %v1180_v58 }
 0x1ad   : > { %2853 = vrcp.f32 %v1199_v59  ;;  %v1211_v9 = vand.u32 2147483648, %v1199_v59  ;;  %v1209_v13 = vand.u32 2147483647, %v1199_v59  ;;  %vm1205_vm0 = vweird.f32 %v1199_v59 }
 0x1ae   : > { %v1171_v61 = vpop.f32.mrf.mxu3  ;;  %2855 = vtanh.f32 %v1175_v62  ;;  %v1193_v17 = vor.u32 1.1754944e-38, %v1192_v8  ;;  %vm1191_vm3 = vcmp.eq.f32.partialorder %v1190_v11, 8.507059e+37 }
 0x1af   : > { %v1212_v20 = vor.u32 1.1754944e-38, %v1211_v9  ;;  %vm1210_vm4 = vcmp.eq.f32.partialorder %v1209_v13, 8.507059e+37 }
 0x1b0   : > { %v1158_v63 = vpop.f32.mrf.mxu2 }
 0x1b1   : > { %v2850_v0 = vpop.eup %2849 }
 0x1b2   : > { %v2852_v1 = vpop.eup %2851  ;;  %v1219_v2 = vadd.f32 1.0, %v2850_v0 }
 0x1b3   : > { %v2854_v3 = vpop.eup %2853  ;;  %v1182_v4 = vmul.f32 %v2852_v1, %v1180_v58  ;;  %vm1187_vm13 = vweird.f32 %v2852_v1 }
 0x1b4   : > { %v1201_v5 = vmul.f32 %v2854_v3, %v1199_v59  ;;  %2857 = vrcp.f32 %v1219_v2  ;;  %vm1206_vm14 = vweird.f32 %v2854_v3  ;;  %v2856_v14 = vpop.eup %2855  ;;  %vm1188_vm1 = vmor %vm1186_vm15, %vm1187_vm13  ;;  %v1231_v32 = vand.u32 2147483648, %v1219_v2 }
 0x1b5   : > { %v1183_v6 = vsub.f32 1.0, %v1182_v4  ;;  %vm1207_vm2 = vmor %vm1205_vm0, %vm1206_vm14  ;;  %vm1225_vm6 = vweird.f32 %v1219_v2  ;;  %v1229_v33 = vand.u32 2147483647, %v1219_v2 }
 0x1b6   : > { %v1202_v7 = vsub.f32 1.0, %v1201_v5  ;;  %v1232_v35 = vor.u32 1.1754944e-38, %v1231_v32 }
 0x1b7   : > { %v1184_v10 = vmul.f32 %v2852_v1, %v1183_v6  ;;  %vm1230_vm8 = vcmp.eq.f32.partialorder %v1229_v33, 8.507059e+37 }
 0x1b8   : > { %v1203_v12 = vmul.f32 %v2854_v3, %v1202_v7 }
 0x1b9   : > { %v1185_v15 = vadd.f32 %v2852_v1, %v1184_v10 }
 0x1ba   : > { %v2858_v16 = vpop.eup %2857  ;;  %v1204_v18 = vadd.f32 %v2854_v3, %v1203_v12 }
 0x1bb   : > { %v1221_v21 = vmul.f32 %v2858_v16, %v1219_v2  ;;  %v1189_v22 = vsel %vm1188_vm1, %v2852_v1, %v1185_v15  ;;  %vm1226_vm5 = vweird.f32 %v2858_v16 }
 0x1bc   : > { %v1194_v23 = vsel %vm1191_vm3, %v1193_v17, %v1189_v22  ;;  %v1208_v24 = vsel %vm1207_vm2, %v2854_v3, %v1204_v18  ;;  %vm1227_vm7 = vmor %vm1225_vm6, %vm1226_vm5 }
 0x1bd   : > { %v1222_v25 = vsub.f32 1.0, %v1221_v21  ;;  %v1213_v26 = vsel %vm1210_vm4, %v1212_v20, %v1208_v24  ;;  %v1236_v27 = vmul.f32 %v2856_v14, %v1194_v23 }
 0x1be   : > { %v1235_v28 = vmul.f32 %v1213_v26, %v922_v19 }
 0x1bf   : > { %v1223_v29 = vmul.f32 %v2858_v16, %v1222_v25 }
 0x1c0   : > { %v1237_v30 = vadd.f32 %v1236_v27, %v1235_v28 }
 0x1c1   : > { %v1224_v31 = vadd.f32 %v2858_v16, %v1223_v29 }
 0x1c2   : > { %2859 = vtanh.f32 %v1237_v30 }
 0x1c3   : > { %v1228_v34 = vsel %vm1227_vm7, %v2858_v16, %v1224_v31 }
 0x1c4   : > { %v1233_v37 = vsel %vm1230_vm8, %v1232_v35, %v1228_v34 }
 0x1c5   : > { %1244 = sbr.rel (%p2399_p10) target bundleno = 460 (0x1cc), region = 56 }
 0x1c8   : > { %v2860_v36 = vpop.eup %2859 }
 0x1c9   : > { %v1239_v38 = vmul.f32 %v2860_v36, %v1233_v37 }
 0x1ca   : > { %1246 = vst [vmem:[%s3593_s15] sm:$0xff] %v1237_v30 }
 0x1cb   : > { %1245 = vst [vmem:[%s3584_s23] sm:$0xff] %v1239_v38 }
 0x1cc PF: > { %v2519_v44 = vld [vmem:[%s4101_s5 + $0xe0] sm:$0xf]  ;;  %v2787_v45 = vld [vmem:[%s4101_s5 + $0xec] sm:$0xf0]  ;;  %v2785_v47 = vld [vmem:[%s4101_s5 + $0xe4] sm:$0xf] }
 0x1cd   : > { %v2520_v46 = vor.u32 %v2787_v45, %v2519_v44  ;;  %v2521_v48 = vld [vmem:[%s4101_s5 + $0xf0] sm:$0xf0]  ;;  %v2786_v49 = vld [vmem:[%s4101_s5 + $0xec] sm:$0xf]  ;;  %v2529_v52 = vld [vmem:[%s4101_s5 + $0xf8] sm:$0xf0] }
 0x1ce   : > { %v2524_v51 = vor.u32 %v2785_v47, %v2521_v48  ;;  %v2503_v53 = vld [vmem:[%s4101_s5 + $0xc0] sm:$0xf]  ;;  %v2783_v54 = vld [vmem:[%s4101_s5 + $0xcc] sm:$0xf0]  ;;  %v2532_v55 = vor.u32 %v2786_v49, %v2529_v52  ;;  %v2781_v57 = vld [vmem:[%s4101_s5 + $0xc4] sm:$0xf] }
 0x1cf   : > { %1473 = vmatpush.bf16.msrb.mxu0 %v2520_v46  ;;  %v2504_v56 = vor.u32 %v2783_v54, %v2503_v53  ;;  %v2505_v58 = vld [vmem:[%s4101_s5 + $0xd0] sm:$0xf0]  ;;  %v2782_v59 = vld [vmem:[%s4101_s5 + $0xcc] sm:$0xf]  ;;  %v2513_v62 = vld [vmem:[%s4101_s5 + $0xd8] sm:$0xf0] }
 0x1d0   : > { %1486 = vmatpush.bf16.msrb.mxu1 %v2524_v51  ;;  %v2508_v61 = vor.u32 %v2781_v57, %v2505_v58  ;;  %v2527_v63 = vld [vmem:[%s4101_s5 + $0xe8] sm:$0xf]  ;;  %v2788_v0 = vld [vmem:[%s4101_s5 + $0xf4] sm:$0xf0]  ;;  %1512 = vmatpush.bf16.msrb.mxu3 %v2532_v55  ;;  %v2516_v1 = vor.u32 %v2782_v59, %v2513_v62  ;;  %v2487_v3 = vld [vmem:[%s4101_s5 + $0xa0] sm:$0xf] }
 0x1d1   : > { %v2528_v2 = vor.u32 %v2788_v0, %v2527_v63  ;;  %v2779_v4 = vld [vmem:[%s4101_s5 + $0xac] sm:$0xf0]  ;;  %v2777_v5 = vld [vmem:[%s4101_s5 + $0xa4] sm:$0xf]  ;;  %v2489_v7 = vld [vmem:[%s4101_s5 + $0xb0] sm:$0xf0] }
 0x1d2   : > { %v1247_v39 = vld [vmem:[%s4104_s8] sm:$0xff]  ;;  %v1248_v40 = vld [vmem:[%s4104_s8 + $0x8] sm:$0xff]  ;;  %v1249_v41 = vld [vmem:[%s4104_s8 + $0x10] sm:$0xff]  ;;  %v2488_v9 = vor.u32 %v2779_v4, %v2487_v3  ;;  %v2492_v13 = vor.u32 %v2777_v5, %v2489_v7  ;;  %s3686_s29 = sadd.s32 2, %s3258_s22 }
 0x1d3   : > { %v1250_v42 = vld [vmem:[%s4104_s8 + $0x18] sm:$0xff]  ;;  %v1251_v43 = vadd.f32 %v1248_v40, %v1247_v39  ;;  %v2778_v8 = vld [vmem:[%s4101_s5 + $0xac] sm:$0xf]  ;;  %1474 = vmatpush.bf16.msrb.mxu0 %v2504_v56  ;;  %1499 = vmatpush.bf16.msrb.mxu2 %v2528_v2  ;;  %v2511_v11 = vld [vmem:[%s4101_s5 + $0xc8] sm:$0xf]  ;;  %s1259_s0 = ssub.s32 0, %s3686_s29 }
 0x1d4   : > { %v2497_v10 = vld [vmem:[%s4101_s5 + $0xb8] sm:$0xf0]  ;;  %v2784_v12 = vld [vmem:[%s4101_s5 + $0xd4] sm:$0xf0]  ;;  %1487 = vmatpush.bf16.msrb.mxu1 %v2508_v61  ;;  %v2471_v15 = vld [vmem:[%s4101_s5 + $0x80] sm:$0xf]  ;;  %1513 = vmatpush.bf16.msrb.mxu3 %v2516_v1  ;;  %s3735_s30 = smin.u32 %s1259_s0, %s3686_s29 }
 0x1d5   : > { %v1252_v50 = vadd.f32 %v1251_v43, %v1249_v41  ;;  %v2512_v14 = vor.u32 %v2784_v12, %v2511_v11  ;;  %v2775_v16 = vld [vmem:[%s4101_s5 + $0x8c] sm:$0xf0]  ;;  %v2500_v17 = vor.u32 %v2778_v8, %v2497_v10  ;;  %v2773_v18 = vld [vmem:[%s4101_s5 + $0x84] sm:$0xf]  ;;  %v2473_v19 = vld [vmem:[%s4101_s5 + $0x90] sm:$0xf0] }
 0x1d6   : > { %v2774_v20 = vld [vmem:[%s4101_s5 + $0x8c] sm:$0xf]  ;;  %v2481_v21 = vld [vmem:[%s4101_s5 + $0x98] sm:$0xf0]  ;;  %v2495_v22 = vld [vmem:[%s4101_s5 + $0xa8] sm:$0xf]  ;;  %v2472_v24 = vor.u32 %v2775_v16, %v2471_v15  ;;  %v2476_v26 = vor.u32 %v2773_v18, %v2473_v19 }
 0x1d7   : > { %v1253_v60 = vadd.f32 %v1252_v50, %v1250_v42  ;;  %v2780_v23 = vld [vmem:[%s4101_s5 + $0xb4] sm:$0xf0]  ;;  %1475 = vmatpush.bf16.msrb.mxu0 %v2488_v9  ;;  %1500 = vmatpush.bf16.msrb.mxu2 %v2512_v14  ;;  %v2455_v27 = vld [vmem:[%s4101_s5 + $0x60] sm:$0xf]  ;;  %v2771_v28 = vld [vmem:[%s4101_s5 + $0x6c] sm:$0xf0]  ;;  %v2484_v30 = vor.u32 %v2774_v20, %v2481_v21 }
 0x1d8   : > { %v2496_v25 = vor.u32 %v2780_v23, %v2495_v22  ;;  %1488 = vmatpush.bf16.msrb.mxu1 %v2492_v13  ;;  %v2769_v29 = vld [vmem:[%s4101_s5 + $0x64] sm:$0xf]  ;;  %1514 = vmatpush.bf16.msrb.mxu3 %v2500_v17  ;;  %v2457_v31 = vld [vmem:[%s4101_s5 + $0x70] sm:$0xf0]  ;;  %v2479_v32 = vld [vmem:[%s4101_s5 + $0x88] sm:$0xf]  ;;  %v2456_v36 = vor.u32 %v2771_v28, %v2455_v27 }
 0x1d9   : > { %v1254_v6 = vmul.f32 0.25, %v1253_v60  ;;  %v2776_v33 = vld [vmem:[%s4101_s5 + $0x94] sm:$0xf0]  ;;  %v2770_v34 = vld [vmem:[%s4101_s5 + $0x6c] sm:$0xf]  ;;  %v2460_v39 = vor.u32 %v2769_v29, %v2457_v31  ;;  %p1258_p11 = scmp.lt.s32.totalorder %s3686_s29, 0 }
 0x1da   : > { %v2465_v35 = vld [vmem:[%s4101_s5 + $0x78] sm:$0xf0]  ;;  %v2480_v37 = vor.u32 %v2776_v33, %v2479_v32  ;;  %v2439_v38 = vld [vmem:[%s4101_s5 + $0x40] sm:$0xf]  ;;  %v2767_v40 = vld [vmem:[%s4101_s5 + $0x4c] sm:$0xf0] }
 0x1db   : > { %2400 = vst [vmem:[%s2974_s20 + $0x8] sm:$0xff] %v1254_v6  ;;  %1476 = vmatpush.bf16.msrb.mxu0 %v2472_v24  ;;  %1501 = vmatpush.bf16.msrb.mxu2 %v2496_v25  ;;  %v2463_v41 = vld [vmem:[%s4101_s5 + $0x68] sm:$0xf]  ;;  %v2772_v42 = vld [vmem:[%s4101_s5 + $0x74] sm:$0xf0]  ;;  %v2468_v43 = vor.u32 %v2770_v34, %v2465_v35  ;;  %s1261_s14 = sand.u32 3, %s3735_s30   ;;  %v2440_v48 = vor.u32 %v2767_v40, %v2439_v38 }
 0x1dc   : > { %1489 = vmatpush.bf16.msrb.mxu1 %v2476_v26  ;;  %1515 = vmatpush.bf16.msrb.mxu3 %v2484_v30  ;;  %v2765_v44 = vld [vmem:[%s4101_s5 + $0x44] sm:$0xf]  ;;  %v2441_v45 = vld [vmem:[%s4101_s5 + $0x50] sm:$0xf0]  ;;  %v2766_v46 = vld [vmem:[%s4101_s5 + $0x4c] sm:$0xf]  ;;  %v2464_v49 = vor.u32 %v2772_v42, %v2463_v41 }
 0x1dd   : > { %v2449_v47 = vld [vmem:[%s4101_s5 + $0x58] sm:$0xf0]  ;;  %v2423_v50 = vld [vmem:[%s4101_s5 + $0x20] sm:$0xf]  ;;  %v2444_v51 = vor.u32 %v2765_v44, %v2441_v45  ;;  %v2763_v52 = vld [vmem:[%s4101_s5 + $0x2c] sm:$0xf0] }
 0x1de   : > { %v2447_v53 = vld [vmem:[%s4101_s5 + $0x48] sm:$0xf]  ;;  %v2768_v54 = vld [vmem:[%s4101_s5 + $0x54] sm:$0xf0]  ;;  %v2452_v55 = vor.u32 %v2766_v46, %v2449_v47  ;;  %v2761_v56 = vld [vmem:[%s4101_s5 + $0x24] sm:$0xf]  ;;  %v2424_v60 = vor.u32 %v2763_v52, %v2423_v50 }
 0x1df   : > { %1477 = vmatpush.bf16.msrb.mxu0 %v2456_v36  ;;  %1502 = vmatpush.bf16.msrb.mxu2 %v2480_v37  ;;  %v2425_v57 = vld [vmem:[%s4101_s5 + $0x30] sm:$0xf0]  ;;  %s1262_s19 = ssub.s32 0, %s1261_s14  ;;  %v2762_v58 = vld [vmem:[%s4101_s5 + $0x2c] sm:$0xf]  ;;  %v2448_v61 = vor.u32 %v2768_v54, %v2447_v53  ;;  %v1276_v17 = vld [vmem:[#allocation2 + $0x40] sm:$0xff] }
 0x1e0   : > { %1490 = vmatpush.bf16.msrb.mxu1 %v2460_v39  ;;  %1516 = vmatpush.bf16.msrb.mxu3 %v2468_v43  ;;  %v2433_v59 = vld [vmem:[%s4101_s5 + $0x38] sm:$0xf0]  ;;  %s4115_s19 = smov (!%p1258_p11, %s1262_s19), %s1261_s14  ;;  %v2407_v62 = vld [vmem:[%s4101_s5] sm:$0xf]  ;;  %v2759_v63 = vld [vmem:[%s4101_s5 + $0xc] sm:$0xf0]  ;;  %v2428_v0 = vor.u32 %v2761_v56, %v2425_v57 }
 0x1e1   : > { %p2403_p12 = scmp.lt.s32.totalorder %s4115_s19, 0  ;;  %s1268_s16 = sadd.s32 4, %s4115_s19  ;;  %v2431_v1 = vld [vmem:[%s4101_s5 + $0x28] sm:$0xf]  ;;  %v2764_v2 = vld [vmem:[%s4101_s5 + $0x34] sm:$0xf0]  ;;  %v2436_v3 = vor.u32 %v2762_v58, %v2433_v59  ;;  %v2408_v8 = vor.u32 %v2759_v63, %v2407_v62 }
 0x1e2   : > { %v2757_v4 = vld [vmem:[%s4101_s5 + $0x4] sm:$0xf]  ;;  %v2409_v5 = vld [vmem:[%s4101_s5 + $0x10] sm:$0xf0]  ;;  %v2758_v6 = vld [vmem:[%s4101_s5 + $0xc] sm:$0xf]  ;;  %v2432_v9 = vor.u32 %v2764_v2, %v2431_v1 }
 0x1e3   : > { %1478 = vmatpush.bf16.msrb.mxu0 %v2440_v48  ;;  %1503 = vmatpush.bf16.msrb.mxu2 %v2464_v49  ;;  %v2417_v7 = vld [vmem:[%s4101_s5 + $0x18] sm:$0xf0]  ;;  %s4117_s16 = smov (!%p2403_p12, %s1268_s16), %s4115_s19  ;;  %v2412_v10 = vor.u32 %v2757_v4, %v2409_v5  ;;  %v2415_v11 = vld [vmem:[%s4101_s5 + $0x8] sm:$0xf]  ;;  %v2760_v12 = vld [vmem:[%s4101_s5 + $0x14] sm:$0xf0] }
 0x1e4   : > { %1491 = vmatpush.bf16.msrb.mxu1 %v2444_v51  ;;  %1517 = vmatpush.bf16.msrb.mxu3 %v2452_v55  ;;  %s2404_s18 = sshll.u32 %s4117_s16, 3  ;;  %v2420_v13 = vor.u32 %v2758_v6, %v2417_v7  ;;  %v2416_v16 = vor.u32 %v2760_v12, %v2415_v11  ;;  %s1592_s14 = sadd.s32 2, %s2962_s13  ;;  %v1277_v18 = vld [vmem:[#allocation2 + $0x20] sm:$0xff]  ;;  %v1279_v25 = vld [vmem:[#allocation2 + $0x38] sm:$0xff]  ;;  %v1278_v36 = vld [vmem:[#allocation2 + $0x10] sm:$0xff] }
 0x1e5   : > { %s3824_s29 = scalar_lea.vmem %s4104_s8, %s2404_s18  ;;  %s3833_s25 = scalar_lea.vmem %s4105_s9, %s2404_s18 }
 0x1e6   : > { %v1272_v14 = vld [vmem:[%s3824_s29] sm:$0xff]  ;;  %p2536_p13 = scmp.ge.s32.totalorder %s1592_s14, 10 }
 0x1e7   : > { %1479 = vmatpush.bf16.msrb.mxu0 %v2424_v60  ;;  %1504 = vmatpush.bf16.msrb.mxu2 %v2448_v61  ;;  %v1280_v15 = vpack.c.bf16 %v1272_v14, %v1272_v14  ;;  %v1274_v59 = vld [vmem:[%s3833_s25] sm:$0xff] }
 0x1e8   : > { %1492 = vmatpush.bf16.msrb.mxu1 %v2428_v0  ;;  %1518 = vmatpush.bf16.msrb.mxu3 %v2436_v3 }
 0x1eb   : > { %1480 = vmatpush.bf16.msrb.mxu0 %v2408_v8  ;;  %1505 = vmatpush.bf16.msrb.mxu2 %v2432_v9 }
 0x1ec   : > { %1493 = vmatpush.bf16.msrb.mxu1 %v2412_v10  ;;  %1519 = vmatpush.bf16.msrb.mxu3 %v2420_v13 }
 0x1ee   : > { %1481 = vmatmul.bf16.vlgmr.msrb.gmra.mxu0 %v1280_v15 }
 0x1ef   : > { %1494 = vmatmul.bf16.vlgmr.msrb.gmra.mxu1 %v1280_v15  ;;  %1506 = vmatpush.bf16.msrb.mxu2 %v2416_v16 }
 0x1f0   : > { %1520 = vmatmul.bf16.vlgmr.msrb.gmra.mxu3 %v1280_v15 }
 0x1f2   : > { %1507 = vmatmul.bf16.vlgmr.msrb.gmra.mxu2 %v1280_v15 }
 0x26b   : > { %v1482_v19 = vpop.f32.mrf.mxu0 }
 0x26c   : > { %v1525_v20 = vadd.f32 %v1482_v19, %v1276_v17  ;;  %v1495_v21 = vpop.f32.mrf.mxu1 }
 0x26d   : > { %v1526_v22 = vadd.f32 %v1495_v21, %v1277_v18 }
 0x26e   : > { %v2533_v23 = vmul.f32 -1.442695, %v1525_v20 }
 0x26f   : > { %v2534_v24 = vmul.f32 -1.442695, %v1526_v22 }
 0x270   : > { %2861 = vpow2.f32 %v2533_v23 }
 0x271   : > { %2863 = vpow2.f32 %v2534_v24 }
 0x273   : > { %v1521_v26 = vpop.f32.mrf.mxu3  ;;  %v1484_v27 = vpop.f32.mrf.mxu0 }
 0x274   : > { %v1528_v28 = vadd.f32 %v1521_v26, %v1279_v25  ;;  %v1497_v29 = vpop.f32.mrf.mxu1 }
 0x275   : > { %v1508_v30 = vpop.f32.mrf.mxu2 }
 0x276   : > { %v2862_v31 = vpop.eup %2861  ;;  %v2535_v32 = vmul.f32 -1.442695, %v1528_v28  ;;  %v1527_v38 = vadd.f32 %v1508_v30, %v1278_v36 }
 0x277   : > { %v2864_v33 = vpop.eup %2863  ;;  %v1532_v34 = vadd.f32 1.0, %v2862_v31 }
 0x278   : > { %v1551_v35 = vadd.f32 1.0, %v2864_v33  ;;  %2865 = vpow2.f32 %v2535_v32 }
 0x279   : > { %2867 = vrcp.f32 %v1532_v34  ;;  %v1544_v48 = vand.u32 2147483648, %v1532_v34  ;;  %v1542_v51 = vand.u32 2147483647, %v1532_v34  ;;  %vm1538_vm11 = vweird.f32 %v1532_v34 }
 0x27a   : > { %2869 = vrcp.f32 %v1551_v35  ;;  %v1563_v49 = vand.u32 2147483648, %v1551_v35  ;;  %v1561_v53 = vand.u32 2147483647, %v1551_v35  ;;  %vm1557_vm12 = vweird.f32 %v1551_v35 }
 0x27b   : > { %v1523_v37 = vpop.f32.mrf.mxu3  ;;  %2871 = vtanh.f32 %v1527_v38  ;;  %v1545_v57 = vor.u32 1.1754944e-38, %v1544_v48  ;;  %vm1543_vm15 = vcmp.eq.f32.partialorder %v1542_v51, 8.507059e+37 }
 0x27c   : > { %v1564_v60 = vor.u32 1.1754944e-38, %v1563_v49  ;;  %vm1562_vm0 = vcmp.eq.f32.partialorder %v1561_v53, 8.507059e+37 }
 0x27d   : > { %v1510_v39 = vpop.f32.mrf.mxu2 }
 0x27e   : > { %v2866_v40 = vpop.eup %2865 }
 0x27f   : > { %v2868_v41 = vpop.eup %2867  ;;  %v1571_v42 = vadd.f32 1.0, %v2866_v40 }
 0x280   : > { %v2870_v43 = vpop.eup %2869  ;;  %v1534_v44 = vmul.f32 %v2868_v41, %v1532_v34  ;;  %vm1539_vm9 = vweird.f32 %v2868_v41 }
 0x281   : > { %v1553_v45 = vmul.f32 %v2870_v43, %v1551_v35  ;;  %2873 = vrcp.f32 %v1571_v42  ;;  %vm1558_vm10 = vweird.f32 %v2870_v43  ;;  %v2872_v54 = vpop.eup %2871  ;;  %vm1540_vm13 = vmor %vm1538_vm11, %vm1539_vm9  ;;  %v1583_v8 = vand.u32 2147483648, %v1571_v42 }
 0x282   : > { %v1535_v46 = vsub.f32 1.0, %v1534_v44  ;;  %vm1559_vm14 = vmor %vm1557_vm12, %vm1558_vm10  ;;  %vm1577_vm2 = vweird.f32 %v1571_v42  ;;  %v1581_v9 = vand.u32 2147483647, %v1571_v42 }
 0x283   : > { %v1554_v47 = vsub.f32 1.0, %v1553_v45  ;;  %v1584_v11 = vor.u32 1.1754944e-38, %v1583_v8 }
 0x284   : > { %v1536_v50 = vmul.f32 %v2868_v41, %v1535_v46  ;;  %vm1582_vm4 = vcmp.eq.f32.partialorder %v1581_v9, 8.507059e+37 }
 0x285   : > { %v1555_v52 = vmul.f32 %v2870_v43, %v1554_v47 }
 0x286   : > { %v1537_v55 = vadd.f32 %v2868_v41, %v1536_v50 }
 0x287   : > { %v2874_v56 = vpop.eup %2873  ;;  %v1556_v58 = vadd.f32 %v2870_v43, %v1555_v52 }
 0x288   : > { %v1573_v61 = vmul.f32 %v2874_v56, %v1571_v42  ;;  %v1541_v62 = vsel %vm1540_vm13, %v2868_v41, %v1537_v55  ;;  %vm1578_vm1 = vweird.f32 %v2874_v56 }
 0x289   : > { %v1546_v63 = vsel %vm1543_vm15, %v1545_v57, %v1541_v62  ;;  %v1560_v0 = vsel %vm1559_vm14, %v2870_v43, %v1556_v58  ;;  %vm1579_vm3 = vmor %vm1577_vm2, %vm1578_vm1 }
 0x28a   : > { %v1574_v1 = vsub.f32 1.0, %v1573_v61  ;;  %v1565_v2 = vsel %vm1562_vm0, %v1564_v60, %v1560_v0  ;;  %v1588_v3 = vmul.f32 %v2872_v54, %v1546_v63 }
 0x28b   : > { %v1587_v4 = vmul.f32 %v1565_v2, %v1274_v59 }
 0x28c   : > { %v1575_v5 = vmul.f32 %v2874_v56, %v1574_v1 }
 0x28d   : > { %v1589_v6 = vadd.f32 %v1588_v3, %v1587_v4 }
 0x28e   : > { %v1576_v7 = vadd.f32 %v2874_v56, %v1575_v5 }
 0x28f   : > { %2875 = vtanh.f32 %v1589_v6 }
 0x290   : > { %v1580_v10 = vsel %vm1579_vm3, %v2874_v56, %v1576_v7 }
 0x291   : > { %v1585_v13 = vsel %vm1582_vm4, %v1584_v11, %v1580_v10 }
 0x292   : > { %1596 = sbr.rel (%p2536_p13) target bundleno = 665 (0x299), region = 60 }
 0x295   : > { %v2876_v12 = vpop.eup %2875 }
 0x296   : > { %v1591_v14 = vmul.f32 %v2876_v12, %v1585_v13 }
 0x297   : > { %1598 = vst [vmem:[%s3833_s25] sm:$0xff] %v1589_v6 }
 0x298   : > { %1597 = vst [vmem:[%s3824_s29] sm:$0xff] %v1591_v14 }
 0x299 PF: > { %v2656_v20 = vld [vmem:[%s4101_s5 + $0xe0] sm:$0xf]  ;;  %v2819_v21 = vld [vmem:[%s4101_s5 + $0xec] sm:$0xf0]  ;;  %v2817_v23 = vld [vmem:[%s4101_s5 + $0xe4] sm:$0xf] }
 0x29a   : > { %v2657_v22 = vor.u32 %v2819_v21, %v2656_v20  ;;  %v2658_v24 = vld [vmem:[%s4101_s5 + $0xf0] sm:$0xf0]  ;;  %v2818_v25 = vld [vmem:[%s4101_s5 + $0xec] sm:$0xf]  ;;  %v2666_v28 = vld [vmem:[%s4101_s5 + $0xf8] sm:$0xf0] }
 0x29b   : > { %v2661_v27 = vor.u32 %v2817_v23, %v2658_v24  ;;  %v2640_v29 = vld [vmem:[%s4101_s5 + $0xc0] sm:$0xf]  ;;  %v2815_v30 = vld [vmem:[%s4101_s5 + $0xcc] sm:$0xf0]  ;;  %v2669_v31 = vor.u32 %v2818_v25, %v2666_v28  ;;  %v2813_v33 = vld [vmem:[%s4101_s5 + $0xc4] sm:$0xf] }
 0x29c   : > { %1825 = vmatpush.bf16.msra.mxu0 %v2657_v22  ;;  %v2641_v32 = vor.u32 %v2815_v30, %v2640_v29  ;;  %v2642_v34 = vld [vmem:[%s4101_s5 + $0xd0] sm:$0xf0]  ;;  %v2814_v35 = vld [vmem:[%s4101_s5 + $0xcc] sm:$0xf]  ;;  %v2650_v38 = vld [vmem:[%s4101_s5 + $0xd8] sm:$0xf0] }
 0x29d   : > { %1838 = vmatpush.bf16.msra.mxu1 %v2661_v27  ;;  %v2645_v37 = vor.u32 %v2813_v33, %v2642_v34  ;;  %v2664_v39 = vld [vmem:[%s4101_s5 + $0xe8] sm:$0xf]  ;;  %v2820_v40 = vld [vmem:[%s4101_s5 + $0xf4] sm:$0xf0]  ;;  %1864 = vmatpush.bf16.msra.mxu3 %v2669_v31  ;;  %v2653_v41 = vor.u32 %v2814_v35, %v2650_v38  ;;  %v2624_v43 = vld [vmem:[%s4101_s5 + $0xa0] sm:$0xf] }
 0x29e   : > { %v2665_v42 = vor.u32 %v2820_v40, %v2664_v39  ;;  %v2811_v44 = vld [vmem:[%s4101_s5 + $0xac] sm:$0xf0]  ;;  %v2809_v45 = vld [vmem:[%s4101_s5 + $0xa4] sm:$0xf]  ;;  %v2626_v47 = vld [vmem:[%s4101_s5 + $0xb0] sm:$0xf0] }
 0x29f   : > { %v1599_v15 = vld [vmem:[%s4104_s8] sm:$0xff]  ;;  %v1600_v16 = vld [vmem:[%s4104_s8 + $0x8] sm:$0xff]  ;;  %v1601_v17 = vld [vmem:[%s4104_s8 + $0x10] sm:$0xff]  ;;  %v2625_v49 = vor.u32 %v2811_v44, %v2624_v43  ;;  %v2629_v53 = vor.u32 %v2809_v45, %v2626_v47  ;;  %s3926_s10 = sadd.s32 3, %s3258_s22 }
 0x2a0   : > { %v1602_v18 = vld [vmem:[%s4104_s8 + $0x18] sm:$0xff]  ;;  %v1603_v19 = vadd.f32 %v1600_v16, %v1599_v15  ;;  %v2810_v48 = vld [vmem:[%s4101_s5 + $0xac] sm:$0xf]  ;;  %1826 = vmatpush.bf16.msra.mxu0 %v2641_v32  ;;  %1851 = vmatpush.bf16.msra.mxu2 %v2665_v42  ;;  %v2648_v51 = vld [vmem:[%s4101_s5 + $0xc8] sm:$0xf]  ;;  %s1611_s14 = ssub.s32 0, %s3926_s10 }
 0x2a1   : > { %v2634_v50 = vld [vmem:[%s4101_s5 + $0xb8] sm:$0xf0]  ;;  %v2816_v52 = vld [vmem:[%s4101_s5 + $0xd4] sm:$0xf0]  ;;  %1839 = vmatpush.bf16.msra.mxu1 %v2645_v37  ;;  %v2608_v55 = vld [vmem:[%s4101_s5 + $0x80] sm:$0xf]  ;;  %1865 = vmatpush.bf16.msra.mxu3 %v2653_v41  ;;  %s3975_s0 = smin.u32 %s1611_s14, %s3926_s10 }
 0x2a2   : > { %v1604_v26 = vadd.f32 %v1603_v19, %v1601_v17  ;;  %v2649_v54 = vor.u32 %v2816_v52, %v2648_v51  ;;  %v2807_v56 = vld [vmem:[%s4101_s5 + $0x8c] sm:$0xf0]  ;;  %v2637_v57 = vor.u32 %v2810_v48, %v2634_v50  ;;  %v2805_v58 = vld [vmem:[%s4101_s5 + $0x84] sm:$0xf]  ;;  %v2610_v59 = vld [vmem:[%s4101_s5 + $0x90] sm:$0xf0] }
 0x2a3   : > { %v2806_v60 = vld [vmem:[%s4101_s5 + $0x8c] sm:$0xf]  ;;  %v2618_v61 = vld [vmem:[%s4101_s5 + $0x98] sm:$0xf0]  ;;  %v2632_v62 = vld [vmem:[%s4101_s5 + $0xa8] sm:$0xf]  ;;  %v2609_v0 = vor.u32 %v2807_v56, %v2608_v55  ;;  %v2613_v2 = vor.u32 %v2805_v58, %v2610_v59 }
 0x2a4   : > { %v1605_v36 = vadd.f32 %v1604_v26, %v1602_v18  ;;  %v2812_v63 = vld [vmem:[%s4101_s5 + $0xb4] sm:$0xf0]  ;;  %1827 = vmatpush.bf16.msra.mxu0 %v2625_v49  ;;  %1852 = vmatpush.bf16.msra.mxu2 %v2649_v54  ;;  %v2592_v3 = vld [vmem:[%s4101_s5 + $0x60] sm:$0xf]  ;;  %v2803_v4 = vld [vmem:[%s4101_s5 + $0x6c] sm:$0xf0]  ;;  %v2621_v6 = vor.u32 %v2806_v60, %v2618_v61 }
 0x2a5   : > { %v2633_v1 = vor.u32 %v2812_v63, %v2632_v62  ;;  %1840 = vmatpush.bf16.msra.mxu1 %v2629_v53  ;;  %v2801_v5 = vld [vmem:[%s4101_s5 + $0x64] sm:$0xf]  ;;  %1866 = vmatpush.bf16.msra.mxu3 %v2637_v57  ;;  %v2594_v7 = vld [vmem:[%s4101_s5 + $0x70] sm:$0xf0]  ;;  %v2616_v8 = vld [vmem:[%s4101_s5 + $0x88] sm:$0xf]  ;;  %v2593_v12 = vor.u32 %v2803_v4, %v2592_v3 }
 0x2a6   : > { %v1606_v46 = vmul.f32 0.25, %v1605_v36  ;;  %v2808_v9 = vld [vmem:[%s4101_s5 + $0x94] sm:$0xf0]  ;;  %v2802_v10 = vld [vmem:[%s4101_s5 + $0x6c] sm:$0xf]  ;;  %v2597_v15 = vor.u32 %v2801_v5, %v2594_v7  ;;  %p1610_p0 = scmp.lt.s32.totalorder %s3926_s10, 0 }
 0x2a7   : > { %v2602_v11 = vld [vmem:[%s4101_s5 + $0x78] sm:$0xf0]  ;;  %v2617_v13 = vor.u32 %v2808_v9, %v2616_v8  ;;  %v2576_v14 = vld [vmem:[%s4101_s5 + $0x40] sm:$0xf]  ;;  %v2799_v16 = vld [vmem:[%s4101_s5 + $0x4c] sm:$0xf0] }
 0x2a8   : > { %2537 = vst [vmem:[%s2974_s20 + $0x10] sm:$0xff] %v1606_v46  ;;  %1828 = vmatpush.bf16.msra.mxu0 %v2609_v0  ;;  %1853 = vmatpush.bf16.msra.mxu2 %v2633_v1  ;;  %v2600_v17 = vld [vmem:[%s4101_s5 + $0x68] sm:$0xf]  ;;  %v2804_v18 = vld [vmem:[%s4101_s5 + $0x74] sm:$0xf0]  ;;  %v2605_v19 = vor.u32 %v2802_v10, %v2602_v11  ;;  %s1613_s28 = sand.u32 3, %s3975_s0   ;;  %v2577_v24 = vor.u32 %v2799_v16, %v2576_v14 }
 0x2a9   : > { %1841 = vmatpush.bf16.msra.mxu1 %v2613_v2  ;;  %1867 = vmatpush.bf16.msra.mxu3 %v2621_v6  ;;  %v2797_v20 = vld [vmem:[%s4101_s5 + $0x44] sm:$0xf]  ;;  %v2578_v21 = vld [vmem:[%s4101_s5 + $0x50] sm:$0xf0]  ;;  %v2798_v22 = vld [vmem:[%s4101_s5 + $0x4c] sm:$0xf]  ;;  %v2601_v25 = vor.u32 %v2804_v18, %v2600_v17 }
 0x2aa   : > { %v2586_v23 = vld [vmem:[%s4101_s5 + $0x58] sm:$0xf0]  ;;  %v2560_v26 = vld [vmem:[%s4101_s5 + $0x20] sm:$0xf]  ;;  %v2581_v27 = vor.u32 %v2797_v20, %v2578_v21  ;;  %v2795_v28 = vld [vmem:[%s4101_s5 + $0x2c] sm:$0xf0] }
 0x2ab   : > { %v2584_v29 = vld [vmem:[%s4101_s5 + $0x48] sm:$0xf]  ;;  %v2800_v30 = vld [vmem:[%s4101_s5 + $0x54] sm:$0xf0]  ;;  %v2589_v31 = vor.u32 %v2798_v22, %v2586_v23  ;;  %v2793_v32 = vld [vmem:[%s4101_s5 + $0x24] sm:$0xf]  ;;  %v2561_v36 = vor.u32 %v2795_v28, %v2560_v26 }
 0x2ac   : > { %1829 = vmatpush.bf16.msra.mxu0 %v2593_v12  ;;  %1854 = vmatpush.bf16.msra.mxu2 %v2617_v13  ;;  %v2562_v33 = vld [vmem:[%s4101_s5 + $0x30] sm:$0xf0]  ;;  %s1614_s26 = ssub.s32 0, %s1613_s28  ;;  %v2794_v34 = vld [vmem:[%s4101_s5 + $0x2c] sm:$0xf]  ;;  %v2585_v37 = vor.u32 %v2800_v30, %v2584_v29  ;;  %s1944_s10 = sadd.s32 3, %s2962_s13 }
 0x2ad   : > { %1842 = vmatpush.bf16.msra.mxu1 %v2597_v15  ;;  %1868 = vmatpush.bf16.msra.mxu3 %v2605_v19  ;;  %v2570_v35 = vld [vmem:[%s4101_s5 + $0x38] sm:$0xf0]  ;;  %s4119_s26 = smov (!%p1610_p0, %s1614_s26), %s1613_s28  ;;  %v2544_v38 = vld [vmem:[%s4101_s5] sm:$0xf]  ;;  %v2791_v39 = vld [vmem:[%s4101_s5 + $0xc] sm:$0xf0]  ;;  %v2565_v40 = vor.u32 %v2793_v32, %v2562_v33 }
 0x2ae   : > { %p2540_p1 = scmp.lt.s32.totalorder %s4119_s26, 0  ;;  %s1620_s17 = sadd.s32 4, %s4119_s26  ;;  %v2568_v41 = vld [vmem:[%s4101_s5 + $0x28] sm:$0xf]  ;;  %v2796_v42 = vld [vmem:[%s4101_s5 + $0x34] sm:$0xf0]  ;;  %v2573_v43 = vor.u32 %v2794_v34, %v2570_v35  ;;  %v2545_v48 = vor.u32 %v2791_v39, %v2544_v38 }
 0x2af   : > { %v2789_v44 = vld [vmem:[%s4101_s5 + $0x4] sm:$0xf]  ;;  %v2546_v45 = vld [vmem:[%s4101_s5 + $0x10] sm:$0xf0]  ;;  %v2790_v46 = vld [vmem:[%s4101_s5 + $0xc] sm:$0xf]  ;;  %v2569_v49 = vor.u32 %v2796_v42, %v2568_v41 }
 0x2b0   : > { %1830 = vmatpush.bf16.msra.mxu0 %v2577_v24  ;;  %1855 = vmatpush.bf16.msra.mxu2 %v2601_v25  ;;  %v2554_v47 = vld [vmem:[%s4101_s5 + $0x18] sm:$0xf0]  ;;  %s4121_s17 = smov (!%p2540_p1, %s1620_s17), %s4119_s26  ;;  %v2549_v50 = vor.u32 %v2789_v44, %v2546_v45  ;;  %v2552_v51 = vld [vmem:[%s4101_s5 + $0x8] sm:$0xf]  ;;  %v2792_v52 = vld [vmem:[%s4101_s5 + $0x14] sm:$0xf0] }
 0x2b1   : > { %1843 = vmatpush.bf16.msra.mxu1 %v2581_v27  ;;  %1869 = vmatpush.bf16.msra.mxu3 %v2589_v31  ;;  %s2541_s19 = sshll.u32 %s4121_s17, 3  ;;  %v2557_v53 = vor.u32 %v2790_v46, %v2554_v47  ;;  %v2553_v56 = vor.u32 %v2792_v52, %v2552_v51  ;;  %v1628_v57 = vld [vmem:[#allocation2 + $0x60] sm:$0xff]  ;;  %v1629_v58 = vld [vmem:[#allocation2 + $0x70] sm:$0xff]  ;;  %v1631_v1 = vld [vmem:[#allocation2 + $0x28] sm:$0xff]  ;;  %p2673_p2 = scmp.ge.s32.totalorder %s1944_s10, 10 }
 0x2b2   : > { %s4064_s0 = scalar_lea.vmem %s4104_s8, %s2541_s19  ;;  %v1630_v12 = vld [vmem:[#allocation2 + $0x78] sm:$0xff]  ;;  %s4073_s15 = scalar_lea.vmem %s4105_s9, %s2541_s19 }
 0x2b3   : > { %v1624_v54 = vld [vmem:[%s4064_s0] sm:$0xff] }
 0x2b4   : > { %1831 = vmatpush.bf16.msra.mxu0 %v2561_v36  ;;  %1856 = vmatpush.bf16.msra.mxu2 %v2585_v37  ;;  %v1632_v55 = vpack.c.bf16 %v1624_v54, %v1624_v54  ;;  %v1626_v35 = vld [vmem:[%s4073_s15] sm:$0xff] }
 0x2b5   : > { %1844 = vmatpush.bf16.msra.mxu1 %v2565_v40  ;;  %1870 = vmatpush.bf16.msra.mxu3 %v2573_v43 }
 0x2b8   : > { %1832 = vmatpush.bf16.msra.mxu0 %v2545_v48  ;;  %1857 = vmatpush.bf16.msra.mxu2 %v2569_v49 }
 0x2b9   : > { %1845 = vmatpush.bf16.msra.mxu1 %v2549_v50  ;;  %1871 = vmatpush.bf16.msra.mxu3 %v2557_v53 }
 0x2bb   : > { %1833 = vmatmul.bf16.vlgmr.msra.gmra.mxu0 %v1632_v55 }
 0x2bc   : > { %1846 = vmatmul.bf16.vlgmr.msra.gmra.mxu1 %v1632_v55  ;;  %1858 = vmatpush.bf16.msra.mxu2 %v2553_v56 }
 0x2bd   : > { %1872 = vmatmul.bf16.vlgmr.msra.gmra.mxu3 %v1632_v55 }
 0x2bf   : > { %1859 = vmatmul.bf16.vlgmr.msra.gmra.mxu2 %v1632_v55 }
 0x338   : > { %v1834_v59 = vpop.f32.mrf.mxu0 }
 0x339   : > { %v1877_v60 = vadd.f32 %v1834_v59, %v1628_v57  ;;  %v1847_v61 = vpop.f32.mrf.mxu1 }
 0x33a   : > { %v1878_v62 = vadd.f32 %v1847_v61, %v1629_v58 }
 0x33b   : > { %v2670_v63 = vmul.f32 -1.442695, %v1877_v60 }
 0x33c   : > { %v2671_v0 = vmul.f32 -1.442695, %v1878_v62 }
 0x33d   : > { %2877 = vpow2.f32 %v2670_v63 }
 0x33e   : > { %2879 = vpow2.f32 %v2671_v0 }
 0x340   : > { %v1873_v2 = vpop.f32.mrf.mxu3  ;;  %v1836_v3 = vpop.f32.mrf.mxu0 }
 0x341   : > { %v1880_v4 = vadd.f32 %v1873_v2, %v1631_v1  ;;  %v1849_v5 = vpop.f32.mrf.mxu1 }
 0x342   : > { %v1860_v6 = vpop.f32.mrf.mxu2 }
 0x343   : > { %v2878_v7 = vpop.eup %2877  ;;  %v2672_v8 = vmul.f32 -1.442695, %v1880_v4  ;;  %v1879_v14 = vadd.f32 %v1860_v6, %v1630_v12 }
 0x344   : > { %v2880_v9 = vpop.eup %2879  ;;  %v1884_v10 = vadd.f32 1.0, %v2878_v7 }
 0x345   : > { %v1903_v11 = vadd.f32 1.0, %v2880_v9  ;;  %2881 = vpow2.f32 %v2672_v8 }
 0x346   : > { %2883 = vrcp.f32 %v1884_v10  ;;  %v1896_v24 = vand.u32 2147483648, %v1884_v10  ;;  %v1894_v27 = vand.u32 2147483647, %v1884_v10  ;;  %vm1890_vm7 = vweird.f32 %v1884_v10 }
 0x347   : > { %2885 = vrcp.f32 %v1903_v11  ;;  %v1915_v25 = vand.u32 2147483648, %v1903_v11  ;;  %v1913_v29 = vand.u32 2147483647, %v1903_v11  ;;  %vm1909_vm8 = vweird.f32 %v1903_v11 }
 0x348   : > { %v1875_v13 = vpop.f32.mrf.mxu3  ;;  %2887 = vtanh.f32 %v1879_v14  ;;  %v1897_v33 = vor.u32 1.1754944e-38, %v1896_v24  ;;  %vm1895_vm11 = vcmp.eq.f32.partialorder %v1894_v27, 8.507059e+37 }
 0x349   : > { %v1916_v36 = vor.u32 1.1754944e-38, %v1915_v25  ;;  %vm1914_vm12 = vcmp.eq.f32.partialorder %v1913_v29, 8.507059e+37 }
 0x34a   : > { %v1862_v15 = vpop.f32.mrf.mxu2 }
 0x34b   : > { %v2882_v16 = vpop.eup %2881 }
 0x34c   : > { %v2884_v17 = vpop.eup %2883  ;;  %v1923_v18 = vadd.f32 1.0, %v2882_v16 }
 0x34d   : > { %v2886_v19 = vpop.eup %2885  ;;  %v1886_v20 = vmul.f32 %v2884_v17, %v1884_v10  ;;  %vm1891_vm5 = vweird.f32 %v2884_v17 }
 0x34e   : > { %v1905_v21 = vmul.f32 %v2886_v19, %v1903_v11  ;;  %2889 = vrcp.f32 %v1923_v18  ;;  %vm1910_vm6 = vweird.f32 %v2886_v19  ;;  %v2888_v30 = vpop.eup %2887  ;;  %vm1892_vm9 = vmor %vm1890_vm7, %vm1891_vm5  ;;  %v1935_v48 = vand.u32 2147483648, %v1923_v18 }
 0x34f   : > { %v1887_v22 = vsub.f32 1.0, %v1886_v20  ;;  %vm1911_vm10 = vmor %vm1909_vm8, %vm1910_vm6  ;;  %vm1929_vm14 = vweird.f32 %v1923_v18  ;;  %v1933_v49 = vand.u32 2147483647, %v1923_v18 }
 0x350   : > { %v1906_v23 = vsub.f32 1.0, %v1905_v21  ;;  %v1936_v51 = vor.u32 1.1754944e-38, %v1935_v48 }
 0x351   : > { %v1888_v26 = vmul.f32 %v2884_v17, %v1887_v22  ;;  %vm1934_vm0 = vcmp.eq.f32.partialorder %v1933_v49, 8.507059e+37 }
 0x352   : > { %v1907_v28 = vmul.f32 %v2886_v19, %v1906_v23 }
 0x353   : > { %v1889_v31 = vadd.f32 %v2884_v17, %v1888_v26 }
 0x354   : > { %v2890_v32 = vpop.eup %2889  ;;  %v1908_v34 = vadd.f32 %v2886_v19, %v1907_v28 }
 0x355   : > { %v1925_v37 = vmul.f32 %v2890_v32, %v1923_v18  ;;  %v1893_v38 = vsel %vm1892_vm9, %v2884_v17, %v1889_v31  ;;  %vm1930_vm13 = vweird.f32 %v2890_v32 }
 0x356   : > { %v1898_v39 = vsel %vm1895_vm11, %v1897_v33, %v1893_v38  ;;  %v1912_v40 = vsel %vm1911_vm10, %v2886_v19, %v1908_v34  ;;  %vm1931_vm15 = vmor %vm1929_vm14, %vm1930_vm13 }
 0x357   : > { %v1926_v41 = vsub.f32 1.0, %v1925_v37  ;;  %v1917_v42 = vsel %vm1914_vm12, %v1916_v36, %v1912_v40  ;;  %v1940_v43 = vmul.f32 %v2888_v30, %v1898_v39 }
 0x358   : > { %v1939_v44 = vmul.f32 %v1917_v42, %v1626_v35 }
 0x359   : > { %v1927_v45 = vmul.f32 %v2890_v32, %v1926_v41 }
 0x35a   : > { %v1941_v46 = vadd.f32 %v1940_v43, %v1939_v44 }
 0x35b   : > { %v1928_v47 = vadd.f32 %v2890_v32, %v1927_v45 }
 0x35c   : > { %2891 = vtanh.f32 %v1941_v46 }
 0x35d   : > { %v1932_v50 = vsel %vm1931_vm15, %v2890_v32, %v1928_v47 }
 0x35e   : > { %v1937_v53 = vsel %vm1934_vm0, %v1936_v51, %v1932_v50 }
 0x35f   : > { %1948 = sbr.rel (%p2673_p2) target bundleno = 870 (0x366), region = 64 }
 0x362   : > { %v2892_v52 = vpop.eup %2891 }
 0x363   : > { %v1943_v54 = vmul.f32 %v2892_v52, %v1937_v53 }
 0x364   : > { %1950 = vst [vmem:[%s4073_s15] sm:$0xff] %v1941_v46 }
 0x365   : > { %1949 = vst [vmem:[%s4064_s0] sm:$0xff] %v1943_v54 }
 0x366 PF:  {}
 0x36c   : > { %v1951_v55 = vld [vmem:[%s4104_s8] sm:$0xff]  ;;  %v1952_v56 = vld [vmem:[%s4104_s8 + $0x8] sm:$0xff]  ;;  %v1953_v57 = vld [vmem:[%s4104_s8 + $0x10] sm:$0xff] }
 0x36d   : > { %v1955_v58 = vadd.f32 %v1952_v56, %v1951_v55  ;;  %v1954_v59 = vld [vmem:[%s4104_s8 + $0x18] sm:$0xff] }
 0x36f   : > { %v1956_v60 = vadd.f32 %v1955_v58, %v1953_v57 }
 0x371   : > { %v1957_v61 = vadd.f32 %v1956_v60, %v1954_v59 }
 0x373   : > { %v1958_v62 = vmul.f32 0.25, %v1957_v61 }
 0x375   : > { %2674 = vst [vmem:[%s2974_s20 + $0x18] sm:$0xff] %v1958_v62 }
 0x376 PF: > { %s21_s11 = sadd.s32 1, %s2899_s11  }
 0x377   : > { %p18_p3 = scmp.ge.s32.totalorder %s21_s11, 5  }
 0x379   :  { %20 = sbr.rel (!%p18_p3) target bundleno = 2 (0x2), region = 124 }

</bundles_post_ra>
